<compile_context>
chip_gen: v5e
topology: v5e:2x2
jax: 0.10.0
libtpu: 0.0.40
codegen_flags: <defaults>
</compile_context>

<pallas_src>
import math
import jax
import jax.numpy as jnp
from jax.experimental import pallas as pl
from jax.experimental.pallas import tpu as pltpu

# ----------------------------- synthetic config ------------------------------
VOCAB = 64
MAX_POS = 16
HIDDEN = 32            # stands in for BERT_HIDDEN_SIZE = 768
N_HEADS = 2
HEAD_DIM = HIDDEN // N_HEADS
FFN = 64
N_LAYERS = 2
N_SENTIMENT_CLASSES = 5
BATCH = 2
SEQ = 8
LN_EPS = 1e-12

N_ENC_ARGS = 20        # number of encoder tensors fed to every fused kernel


# ------------------------------- kernel helpers ------------------------------
def _layernorm(x, g, b):
    mean = jnp.mean(x, axis=-1, keepdims=True)
    var = jnp.mean((x - mean) ** 2, axis=-1, keepdims=True)
    return (x - mean) * jax.lax.rsqrt(var + LN_EPS) * g + b


def _softmax(x, approx=True):
    m = jnp.max(x, axis=-1, keepdims=True)
    e = jnp.exp(x - m)
    s = jnp.sum(e, axis=-1, keepdims=True)
    if approx:
        return e * pl.reciprocal(s, approx=True)
    return e / s


def _gelu(x):
    # TODO(synk): HF BERT uses exact erf GELU; tanh approximation differs by <1e-3.
    return 0.5 * x * (1.0 + jnp.tanh(0.7978845608028654 * (x + 0.044715 * x * x * x)))


def _encoder_core(enc_refs, B, S):
    """Embedding LayerNorm + all N_LAYERS encoder layers. Returns (B*S, H)."""
    (x_ref, mb_ref, eg_ref, eb_ref,
     wq_ref, bq_ref, wk_ref, bk_ref, wv_ref, bv_ref,
     wo_ref, bo_ref, ln1g_ref, ln1b_ref,
     w1_ref, b1_ref, w2_ref, b2_ref, ln2g_ref, ln2b_ref) = enc_refs
    H = HIDDEN
    x = _layernorm(x_ref[...].reshape(B * S, H), eg_ref[...], eb_ref[...])
    mb = mb_ref[...]                                   # (B, 1, S)
    scale = 1.0 / math.sqrt(HEAD_DIM)

    for l in range(N_LAYERS):          # static unroll, weights VMEM-resident
        attn = jnp.zeros((B * S, H), jnp.float32)
        for h in range(N_HEADS):       # per-head weights: no lane slicing / concat
            qh = (jnp.dot(x, wq_ref[l, h], preferred_element_type=jnp.float32)
                  + bq_ref[l, h]).reshape(B, S, HEAD_DIM)
            kh = (jnp.dot(x, wk_ref[l, h], preferred_element_type=jnp.float32)
                  + bk_ref[l, h]).reshape(B, S, HEAD_DIM)
            vh = (jnp.dot(x, wv_ref[l, h], preferred_element_type=jnp.float32)
                  + bv_ref[l, h]).reshape(B, S, HEAD_DIM)
            scores = jnp.einsum("bqd,bkd->bqk", qh, kh,
                                preferred_element_type=jnp.float32) * scale + mb
            probs = _softmax(scores)
            ctx = jnp.einsum("bqk,bkd->bqd", probs, vh,
                             preferred_element_type=jnp.float32)
            # (concat_h ctx_h) @ Wo  ==  sum_h ctx_h @ Wo_h  — avoids lane concat.
            attn = attn + jnp.dot(ctx.reshape(B * S, HEAD_DIM), wo_ref[l, h],
                                  preferred_element_type=jnp.float32)
        x = _layernorm(x + attn + bo_ref[l], ln1g_ref[l], ln1b_ref[l])
        h1 = _gelu(jnp.dot(x, w1_ref[l], preferred_element_type=jnp.float32)
                   + b1_ref[l])
        h2 = jnp.dot(h1, w2_ref[l], preferred_element_type=jnp.float32) + b2_ref[l]
        x = _layernorm(x + h2, ln2g_ref[l], ln2b_ref[l])
    return x


def _cls_rows(x, n, S):
    """Rows 0, S, 2S, ... of the flattened (n*S, H) hidden states (static slices)."""
    return jnp.concatenate([x[b * S:b * S + 1, :] for b in range(n)], axis=0)


# ------------------------------ fused Pallas kernels --------------------------
def sentiment_ssa_kernel(mp_ref, *refs):
    """Encoder + sentiment classifier + in-kernel masked gather + SSA linear."""
    enc_refs = refs[:N_ENC_ARGS]
    (sw_ref, sb_ref, aw_ref, ab_ref,
     logit_ref, ssa_ref, hid_scr) = refs[N_ENC_ARGS:]
    B, S, _ = enc_refs[0].shape
    x = _encoder_core(enc_refs, B, S)                       # (B*S, H)
    hid_scr[...] = x

    cls = _cls_rows(x, B, S)                                # (B, H)
    logit_ref[...] = (jnp.dot(cls, sw_ref[...],
                              preferred_element_type=jnp.float32) + sb_ref[...])

    Bm, M = mp_ref.shape                                    # SMEM int32 positions
    rows = []
    for b in range(Bm):
        for m in range(M):
            r = b * S + mp_ref[b, m]                        # scalar from SMEM
            rows.append(hid_scr[pl.ds(r, 1), :])            # dynamic sublane slice
    mh = jnp.concatenate(rows, axis=0)                      # (B*M, H)
    ssa_ref[...] = (jnp.dot(mh, aw_ref[...],
                            preferred_element_type=jnp.float32) + ab_ref[...])


def sentiment_kernel(*refs):
    """Encoder + sentiment classifier (no masked positions)."""
    enc_refs = refs[:N_ENC_ARGS]
    sw_ref, sb_ref, logit_ref = refs[N_ENC_ARGS:]
    B, S, _ = enc_refs[0].shape
    x = _encoder_core(enc_refs, B, S)
    cls = _cls_rows(x, B, S)
    logit_ref[...] = (jnp.dot(cls, sw_ref[...],
                              preferred_element_type=jnp.float32) + sb_ref[...])


def pair_kernel(*refs):
    """Encoder over stacked (2B) batch + Linear(2H->1) on cat(cls1, cls2)."""
    enc_refs = refs[:N_ENC_ARGS]
    wa_ref, wb_ref, b_ref, logit_ref, seq_ref = refs[N_ENC_ARGS:]
    B2, S, H = enc_refs[0].shape
    B = B2 // 2
    x = _encoder_core(enc_refs, B2, S)                      # (2B*S, H)
    seq_ref[...] = x.reshape(B2, S, H)
    cls = _cls_rows(x, B2, S)                               # (2B, H)
    c1, c2 = cls[:B], cls[B:]
    # cat(c1, c2) @ W == c1 @ Wa + c2 @ Wb  — two lane reductions, no concat.
    logit_ref[...] = (jnp.sum(c1 * wa_ref[...], axis=-1, keepdims=True)
                      + jnp.sum(c2 * wb_ref[...], axis=-1, keepdims=True)
                      + b_ref[...])


def qa_kernel(*refs):
    """Encoder + qa_classifier + no_answer_classifier + softmax over (S+1)."""
    enc_refs = refs[:N_ENC_ARGS]
    (qaw_ref, qab_ref, naw_ref, nab_ref,
     start_ref, end_ref, seq_ref) = refs[N_ENC_ARGS:]
    B, S, H = enc_refs[0].shape
    x = _encoder_core(enc_refs, B, S)                       # (B*S, H)
    seq = x.reshape(B, S, H)
    seq_ref[...] = seq
    cls = _cls_rows(x, B, S)                                # (B, H)
    start_l = jnp.sum(seq * qaw_ref[0][None], axis=-1) + qab_ref[0]   # (B, S)
    end_l = jnp.sum(seq * qaw_ref[1][None], axis=-1) + qab_ref[1]     # (B, S)
    noans = jnp.sum(cls * naw_ref[...], axis=-1, keepdims=True) + nab_ref[...]
    start_ref[...] = _softmax(jnp.concatenate([start_l, noans], axis=-1), approx=False)
    end_ref[...] = _softmax(jnp.concatenate([end_l, noans], axis=-1), approx=False)


def linear_kernel(x_ref, w_ref, b_ref, o_ref):
    o_ref[...] = (jnp.dot(x_ref[...], w_ref[...],
                          preferred_element_type=jnp.float32) + b_ref[...])


# ------------------------------- pallas wrappers ------------------------------
def _vmem():
    return pl.BlockSpec(memory_space=pltpu.MemorySpace.VMEM)


def _smem():
    return pl.BlockSpec(memory_space=pltpu.MemorySpace.SMEM)


# ---------------------------- parameter construction --------------------------
def init_params(key):
    keys = iter(jax.random.split(key, 32))

    def nrm(shape):
        return jax.random.normal(next(keys), shape, jnp.float32) * 0.02

    params = {
        "word_emb": nrm((VOCAB, HIDDEN)),
        "pos_emb": nrm((MAX_POS, HIDDEN)),
        "type_emb": nrm((2, HIDDEN)),
        "emb_ln_g": jnp.ones((1, HIDDEN), jnp.float32),
        "emb_ln_b": jnp.zeros((1, HIDDEN), jnp.float32),
        # ---- stacked encoder weights; Q/K/V and O pre-split per head ----
        "wq": nrm((N_LAYERS, N_HEADS, HIDDEN, HEAD_DIM)),
        "bq": jnp.zeros((N_LAYERS, N_HEADS, 1, HEAD_DIM), jnp.float32),
        "wk": nrm((N_LAYERS, N_HEADS, HIDDEN, HEAD_DIM)),
        "bk": jnp.zeros((N_LAYERS, N_HEADS, 1, HEAD_DIM), jnp.float32),
        "wv": nrm((N_LAYERS, N_HEADS, HIDDEN, HEAD_DIM)),
        "bv": jnp.zeros((N_LAYERS, N_HEADS, 1, HEAD_DIM), jnp.float32),
        "wo": nrm((N_LAYERS, N_HEADS, HEAD_DIM, HIDDEN)),
        "bo": jnp.zeros((N_LAYERS, 1, HIDDEN), jnp.float32),
        "ln1g": jnp.ones((N_LAYERS, 1, HIDDEN), jnp.float32),
        "ln1b": jnp.zeros((N_LAYERS, 1, HIDDEN), jnp.float32),
        "w1": nrm((N_LAYERS, HIDDEN, FFN)),
        "b1": jnp.zeros((N_LAYERS, 1, FFN), jnp.float32),
        "w2": nrm((N_LAYERS, FFN, HIDDEN)),
        "b2": jnp.zeros((N_LAYERS, 1, HIDDEN), jnp.float32),
        "ln2g": jnp.ones((N_LAYERS, 1, HIDDEN), jnp.float32),
        "ln2b": jnp.zeros((N_LAYERS, 1, HIDDEN), jnp.float32),
        # ---- task heads (same semantics as the nn.Linear heads) ----
        "sent_w": nrm((HIDDEN, N_SENTIMENT_CLASSES)),
        "sent_b": jnp.zeros((1, N_SENTIMENT_CLASSES), jnp.float32),
        "para_wa": nrm((1, HIDDEN)), "para_wb": nrm((1, HIDDEN)),
        "para_b": jnp.zeros((1, 1), jnp.float32),
        "sim_wa": nrm((1, HIDDEN)), "sim_wb": nrm((1, HIDDEN)),
        "sim_b": jnp.zeros((1, 1), jnp.float32),
        "ssa_w": nrm((HIDDEN, HIDDEN)),
        "ssa_b": jnp.zeros((1, HIDDEN), jnp.float32),
        "qa_w": nrm((2, 1, HIDDEN)),            # row 0 = start, row 1 = end
        "qa_b": jnp.zeros((2, 1, 1), jnp.float32),
        "noans_w": nrm((1, HIDDEN)),
        "noans_b": jnp.zeros((1, 1), jnp.float32),
    }
    return params


# --------------------------------- model glue ---------------------------------
def _enc_inputs(params, input_ids, attention_mask):
    B, S = input_ids.shape
    x = (params["word_emb"][input_ids]
         + params["pos_emb"][:S][None, :, :]
         + params["type_emb"][0][None, None, :])
    mask_bias = ((1.0 - attention_mask.astype(jnp.float32)) * -10000.0).reshape(B, 1, S)
    return [x, mask_bias, params["emb_ln_g"], params["emb_ln_b"],
            params["wq"], params["bq"], params["wk"], params["bk"],
            params["wv"], params["bv"], params["wo"], params["bo"],
            params["ln1g"], params["ln1b"],
            params["w1"], params["b1"], params["w2"], params["b2"],
            params["ln2g"], params["ln2b"]]


def _gather_masked(last_hidden, masked_positions):
    B, M = masked_positions.shape
    batch_idx = jnp.repeat(jnp.arange(B), M)
    pos_flat = masked_positions.reshape(-1).astype(jnp.int32)
    return last_hidden[batch_idx, pos_flat]                    # (B*M, H)


def _ssa_weights(params, last_hidden, masked_positions):
    mh = _gather_masked(last_hidden, masked_positions)
    out = pl.pallas_call(
        linear_kernel,
        out_shape=jax.ShapeDtypeStruct((mh.shape[0], HIDDEN), jnp.float32),
        in_specs=[_vmem()] * 3,
        out_specs=_vmem(),
    )(mh, params["ssa_w"], params["ssa_b"])
    return out.astype(jnp.float32)


# TODO(synk): per-layer BERT attention-probability return (return_attention_weights)
# is not materialized from the fused attention kernel.
def predict_sentiment(params, input_ids, attention_mask, masked_positions=None):
    B, S = input_ids.shape
    enc_args = _enc_inputs(params, input_ids, attention_mask)
    if masked_positions is None:
        logits = pl.pallas_call(
            sentiment_kernel,
            out_shape=jax.ShapeDtypeStruct((B, N_SENTIMENT_CLASSES), jnp.float32),
            in_specs=[_vmem()] * (N_ENC_ARGS + 2),
            out_specs=_vmem(),
        )(*enc_args, params["sent_w"], params["sent_b"])
        return logits, None

    M = masked_positions.shape[1]
    logits, ssa = pl.pallas_call(
        sentiment_ssa_kernel,
        out_shape=(jax.ShapeDtypeStruct((B, N_SENTIMENT_CLASSES), jnp.float32),
                   jax.ShapeDtypeStruct((B * M, HIDDEN), jnp.float32)),
        in_specs=[_smem()] + [_vmem()] * (N_ENC_ARGS + 4),
        out_specs=(_vmem(), _vmem()),
        scratch_shapes=[pltpu.VMEM((B * S, HIDDEN), jnp.float32)],
    )(masked_positions.astype(jnp.int32), *enc_args,
      params["sent_w"], params["sent_b"], params["ssa_w"], params["ssa_b"])
    return logits, ssa.astype(jnp.float32)


def _pair_task(params, ids1, m1, ids2, m2, mp1, mp2, wa, wb, bias):
    B, S = ids1.shape
    # Single encoder pass: stack the two sentences along the batch axis.
    enc_args = _enc_inputs(params,
                           jnp.concatenate([ids1, ids2], axis=0),
                           jnp.concatenate([m1, m2], axis=0))
    logit, last_hidden = pl.pallas_call(
        pair_kernel,
        out_shape=(jax.ShapeDtypeStruct((B, 1), jnp.float32),
                   jax.ShapeDtypeStruct((2 * B, S, HIDDEN), jnp.float32)),
        in_specs=[_vmem()] * (N_ENC_ARGS + 3),
        out_specs=(_vmem(), _vmem()),
    )(*enc_args, wa, wb, bias)
    a1 = _ssa_weights(params, last_hidden[:B], mp1) if mp1 is not None else None
    a2 = _ssa_weights(params, last_hidden[B:], mp2) if mp2 is not None else None
    return logit, a1, a2


def predict_paraphrase(params, ids1, m1, ids2, m2, mp1=None, mp2=None):
    return _pair_task(params, ids1, m1, ids2, m2, mp1, mp2,
                      params["para_wa"], params["para_wb"], params["para_b"])


def predict_similarity(params, ids1, m1, ids2, m2, mp1=None, mp2=None):
    return _pair_task(params, ids1, m1, ids2, m2, mp1, mp2,
                      params["sim_wa"], params["sim_wb"], params["sim_b"])


def predict_qa(params, input_ids, attention_mask, masked_positions=None):
    B, S = input_ids.shape
    enc_args = _enc_inputs(params, input_ids, attention_mask)
    start_p, end_p, last_hidden = pl.pallas_call(
        qa_kernel,
        out_shape=(jax.ShapeDtypeStruct((B, S + 1), jnp.float32),
                   jax.ShapeDtypeStruct((B, S + 1), jnp.float32),
                   jax.ShapeDtypeStruct((B, S, HIDDEN), jnp.float32)),
        in_specs=[_vmem()] * (N_ENC_ARGS + 4),
        out_specs=(_vmem(), _vmem(), _vmem()),
    )(*enc_args, params["qa_w"], params["qa_b"],
      params["noans_w"], params["noans_b"])
    attn_w = (_ssa_weights(params, last_hidden, masked_positions)
              if masked_positions is not None else None)
    return start_p, end_p, attn_w


# ------------------------------------ main -------------------------------------
if __name__ == "__main__":
    key = jax.random.PRNGKey(0)
    pkey, ikey1, ikey2 = jax.random.split(key, 3)
    params = init_params(pkey)

    input_ids_1 = jax.random.randint(ikey1, (BATCH, SEQ), 0, VOCAB, dtype=jnp.int32)
    input_ids_2 = jax.random.randint(ikey2, (BATCH, SEQ), 0, VOCAB, dtype=jnp.int32)
    attn_mask_1 = jnp.array([[1, 1, 1, 1, 1, 1, 1, 1],
                             [1, 1, 1, 1, 1, 1, 0, 0]], dtype=jnp.int32)
    attn_mask_2 = jnp.ones((BATCH, SEQ), dtype=jnp.int32)
    masked_positions = jnp.array([[1, 3], [2, 5]], dtype=jnp.int32)

    sent_logits, ssa_weights = predict_sentiment(params, input_ids_1, attn_mask_1,
                                                 masked_positions)
    para_logit, _, _ = predict_paraphrase(params, input_ids_1, attn_mask_1,
                                          input_ids_2, attn_mask_2)
    sim_logit, _, _ = predict_similarity(params, input_ids_1, attn_mask_1,
                                         input_ids_2, attn_mask_2)
    start_p, end_p, _ = predict_qa(params, input_ids_1, attn_mask_1)

    jax.block_until_ready((sent_logits, ssa_weights, para_logit, sim_logit,
                           start_p, end_p))

    assert sent_logits.shape == (BATCH, N_SENTIMENT_CLASSES)
    assert ssa_weights.shape == (BATCH * 2, HIDDEN)
    assert para_logit.shape == (BATCH, 1) and sim_logit.shape == (BATCH, 1)
    assert start_p.shape == (BATCH, SEQ + 1) and end_p.shape == (BATCH, SEQ + 1)

    print("KERNEL_OK")
</pallas_src>

<mosaic_0001>
module attributes {stable_mosaic.version = 11 : i64} {
  func.func @sentiment_ssa_kernel(%arg0: memref<2x2xi32, #tpu.memory_space<smem>>, %arg1: memref<2x8x32xf32, #tpu.memory_space<vmem>>, %arg2: memref<2x1x8xf32, #tpu.memory_space<vmem>>, %arg3: memref<1x32xf32, #tpu.memory_space<vmem>>, %arg4: memref<1x32xf32, #tpu.memory_space<vmem>>, %arg5: memref<2x2x32x16xf32, #tpu.memory_space<vmem>>, %arg6: memref<2x2x1x16xf32, #tpu.memory_space<vmem>>, %arg7: memref<2x2x32x16xf32, #tpu.memory_space<vmem>>, %arg8: memref<2x2x1x16xf32, #tpu.memory_space<vmem>>, %arg9: memref<2x2x32x16xf32, #tpu.memory_space<vmem>>, %arg10: memref<2x2x1x16xf32, #tpu.memory_space<vmem>>, %arg11: memref<2x2x16x32xf32, #tpu.memory_space<vmem>>, %arg12: memref<2x1x32xf32, #tpu.memory_space<vmem>>, %arg13: memref<2x1x32xf32, #tpu.memory_space<vmem>>, %arg14: memref<2x1x32xf32, #tpu.memory_space<vmem>>, %arg15: memref<2x32x64xf32, #tpu.memory_space<vmem>>, %arg16: memref<2x1x64xf32, #tpu.memory_space<vmem>>, %arg17: memref<2x64x32xf32, #tpu.memory_space<vmem>>, %arg18: memref<2x1x32xf32, #tpu.memory_space<vmem>>, %arg19: memref<2x1x32xf32, #tpu.memory_space<vmem>>, %arg20: memref<2x1x32xf32, #tpu.memory_space<vmem>>, %arg21: memref<32x5xf32, #tpu.memory_space<vmem>>, %arg22: memref<1x5xf32, #tpu.memory_space<vmem>>, %arg23: memref<32x32xf32, #tpu.memory_space<vmem>>, %arg24: memref<1x32xf32, #tpu.memory_space<vmem>>, %arg25: memref<2x5xf32, #tpu.memory_space<vmem>>, %arg26: memref<4x32xf32, #tpu.memory_space<vmem>>, %arg27: memref<16x32xf32, #tpu.memory_space<vmem>>) attributes {dimension_semantics = [], scalar_prefetch = 0 : i64, scratch_operands = 1 : i64, tpu.core_type = #tpu.core_type<tc>} {
    %c0 = arith.constant 0 : index
    %c0_0 = arith.constant 0 : index
    %c0_1 = arith.constant 0 : index
    %0 = vector.load %arg1[%c0, %c0_0, %c0_1] : memref<2x8x32xf32, #tpu.memory_space<vmem>>, vector<2x8x32xf32>
    %1 = vector.shape_cast %0 : vector<2x8x32xf32> to vector<16x32xf32>
    %c0_2 = arith.constant 0 : index
    %c0_3 = arith.constant 0 : index
    %2 = vector.load %arg3[%c0_2, %c0_3] : memref<1x32xf32, #tpu.memory_space<vmem>>, vector<1x32xf32>
    %c0_4 = arith.constant 0 : index
    %c0_5 = arith.constant 0 : index
    %3 = vector.load %arg4[%c0_4, %c0_5] : memref<1x32xf32, #tpu.memory_space<vmem>>, vector<1x32xf32>
    %cst = arith.constant dense<0.000000e+00> : vector<16xf32>
    %4 = vector.multi_reduction <add>, %1, %cst [1] : vector<16x32xf32> to vector<16xf32>
    %5 = vector.shape_cast %4 : vector<16xf32> to vector<16x1xf32>
    %cst_6 = arith.constant 3.200000e+01 : f32
    %6 = vector.broadcast %cst_6 : f32 to vector<16x1xf32>
    %7 = arith.divf %5, %6 : vector<16x1xf32>
    %8 = vector.broadcast %7 : vector<16x1xf32> to vector<16x32xf32>
    %9 = arith.subf %1, %8 : vector<16x32xf32>
    %10 = arith.mulf %9, %9 : vector<16x32xf32>
    %cst_7 = arith.constant dense<0.000000e+00> : vector<16xf32>
    %11 = vector.multi_reduction <add>, %10, %cst_7 [1] : vector<16x32xf32> to vector<16xf32>
    %12 = vector.shape_cast %11 : vector<16xf32> to vector<16x1xf32>
    %cst_8 = arith.constant 3.200000e+01 : f32
    %13 = vector.broadcast %cst_8 : f32 to vector<16x1xf32>
    %14 = arith.divf %12, %13 : vector<16x1xf32>
    %15 = vector.broadcast %7 : vector<16x1xf32> to vector<16x32xf32>
    %16 = arith.subf %1, %15 : vector<16x32xf32>
    %cst_9 = arith.constant 9.99999996E-13 : f32
    %17 = vector.broadcast %cst_9 : f32 to vector<16x1xf32>
    %18 = arith.addf %14, %17 : vector<16x1xf32>
    %19 = math.rsqrt %18 : vector<16x1xf32>
    %20 = vector.broadcast %19 : vector<16x1xf32> to vector<16x32xf32>
    %21 = arith.mulf %16, %20 : vector<16x32xf32>
    %22 = vector.broadcast %2 : vector<1x32xf32> to vector<16x32xf32>
    %23 = arith.mulf %21, %22 : vector<16x32xf32>
    %24 = vector.broadcast %3 : vector<1x32xf32> to vector<16x32xf32>
    %25 = arith.addf %23, %24 : vector<16x32xf32>
    %c0_10 = arith.constant 0 : index
    %c0_11 = arith.constant 0 : index
    %c0_12 = arith.constant 0 : index
    %26 = vector.load %arg2[%c0_10, %c0_11, %c0_12] : memref<2x1x8xf32, #tpu.memory_space<vmem>>, vector<2x1x8xf32>
    %cst_13 = arith.constant 0.000000e+00 : f32
    %27 = vector.broadcast %cst_13 : f32 to vector<16x32xf32>
    %c0_14 = arith.constant 0 : index
    %c0_15 = arith.constant 0 : index
    %c0_16 = arith.constant 0 : index
    %c0_17 = arith.constant 0 : index
    %28 = vector.load %arg5[%c0_14, %c0_15, %c0_16, %c0_17] : memref<2x2x32x16xf32, #tpu.memory_space<vmem>>, vector<1x1x32x16xf32>
    %29 = vector.shape_cast %28 : vector<1x1x32x16xf32> to vector<32x16xf32>
    %cst_18 = arith.constant dense<0.000000e+00> : vector<16x16xf32>
    %30 = tpu.matmul %25, %29, %cst_18 {dimension_numbers = #tpu.dot_dimension_numbers<[1], [0], [0], [1], [0, 0, 1, 1], [], []>} : vector<16x32xf32>, vector<32x16xf32>, vector<16x16xf32> -> vector<16x16xf32>
    %c0_19 = arith.constant 0 : index
    %c0_20 = arith.constant 0 : index
    %c0_21 = arith.constant 0 : index
    %c0_22 = arith.constant 0 : index
    %31 = vector.load %arg6[%c0_19, %c0_20, %c0_21, %c0_22] : memref<2x2x1x16xf32, #tpu.memory_space<vmem>>, vector<1x1x1x16xf32>
    %32 = vector.shape_cast %31 : vector<1x1x1x16xf32> to vector<1x16xf32>
    %33 = vector.broadcast %32 : vector<1x16xf32> to vector<16x16xf32>
    %34 = arith.addf %30, %33 : vector<16x16xf32>
    %35 = vector.shape_cast %34 : vector<16x16xf32> to vector<2x8x16xf32>
    %c0_23 = arith.constant 0 : index
    %c0_24 = arith.constant 0 : index
    %c0_25 = arith.constant 0 : index
    %c0_26 = arith.constant 0 : index
    %36 = vector.load %arg7[%c0_23, %c0_24, %c0_25, %c0_26] : memref<2x2x32x16xf32, #tpu.memory_space<vmem>>, vector<1x1x32x16xf32>
    %37 = vector.shape_cast %36 : vector<1x1x32x16xf32> to vector<32x16xf32>
    %cst_27 = arith.constant dense<0.000000e+00> : vector<16x16xf32>
    %38 = tpu.matmul %25, %37, %cst_27 {dimension_numbers = #tpu.dot_dimension_numbers<[1], [0], [0], [1], [0, 0, 1, 1], [], []>} : vector<16x32xf32>, vector<32x16xf32>, vector<16x16xf32> -> vector<16x16xf32>
    %c0_28 = arith.constant 0 : index
    %c0_29 = arith.constant 0 : index
    %c0_30 = arith.constant 0 : index
    %c0_31 = arith.constant 0 : index
    %39 = vector.load %arg8[%c0_28, %c0_29, %c0_30, %c0_31] : memref<2x2x1x16xf32, #tpu.memory_space<vmem>>, vector<1x1x1x16xf32>
    %40 = vector.shape_cast %39 : vector<1x1x1x16xf32> to vector<1x16xf32>
    %41 = vector.broadcast %40 : vector<1x16xf32> to vector<16x16xf32>
    %42 = arith.addf %38, %41 : vector<16x16xf32>
    %43 = vector.shape_cast %42 : vector<16x16xf32> to vector<2x8x16xf32>
    %c0_32 = arith.constant 0 : index
    %c0_33 = arith.constant 0 : index
    %c0_34 = arith.constant 0 : index
    %c0_35 = arith.constant 0 : index
    %44 = vector.load %arg9[%c0_32, %c0_33, %c0_34, %c0_35] : memref<2x2x32x16xf32, #tpu.memory_space<vmem>>, vector<1x1x32x16xf32>
    %45 = vector.shape_cast %44 : vector<1x1x32x16xf32> to vector<32x16xf32>
    %cst_36 = arith.constant dense<0.000000e+00> : vector<16x16xf32>
    %46 = tpu.matmul %25, %45, %cst_36 {dimension_numbers = #tpu.dot_dimension_numbers<[1], [0], [0], [1], [0, 0, 1, 1], [], []>} : vector<16x32xf32>, vector<32x16xf32>, vector<16x16xf32> -> vector<16x16xf32>
    %c0_37 = arith.constant 0 : index
    %c0_38 = arith.constant 0 : index
    %c0_39 = arith.constant 0 : index
    %c0_40 = arith.constant 0 : index
    %47 = vector.load %arg10[%c0_37, %c0_38, %c0_39, %c0_40] : memref<2x2x1x16xf32, #tpu.memory_space<vmem>>, vector<1x1x1x16xf32>
    %48 = vector.shape_cast %47 : vector<1x1x1x16xf32> to vector<1x16xf32>
    %49 = vector.broadcast %48 : vector<1x16xf32> to vector<16x16xf32>
    %50 = arith.addf %46, %49 : vector<16x16xf32>
    %51 = vector.shape_cast %50 : vector<16x16xf32> to vector<2x8x16xf32>
    "tpu.trace_start"() <{level = 10 : i32, message = "bqd,bkd->bqk"}> : () -> ()
    %cst_41 = arith.constant dense<0.000000e+00> : vector<2x8x8xf32>
    %52 = tpu.matmul %35, %43, %cst_41 {dimension_numbers = #tpu.dot_dimension_numbers<[2], [2], [1], [1], [0, 0, 0, 1, 1, 1], [0], [0]>} : vector<2x8x16xf32>, vector<2x8x16xf32>, vector<2x8x8xf32> -> vector<2x8x8xf32>
    "tpu.trace_stop"() : () -> ()
    %cst_42 = arith.constant 2.500000e-01 : f32
    %53 = vector.broadcast %cst_42 : f32 to vector<2x8x8xf32>
    %54 = arith.mulf %52, %53 : vector<2x8x8xf32>
    %55 = vector.broadcast %26 : vector<2x1x8xf32> to vector<2x8x8xf32>
    %56 = arith.addf %54, %55 : vector<2x8x8xf32>
    %cst_43 = arith.constant dense<0xFF800000> : vector<2x8xf32>
    %57 = vector.multi_reduction <maximumf>, %56, %cst_43 [2] : vector<2x8x8xf32> to vector<2x8xf32>
    %58 = vector.shape_cast %57 : vector<2x8xf32> to vector<2x8x1xf32>
    %59 = vector.broadcast %58 : vector<2x8x1xf32> to vector<2x8x8xf32>
    %60 = arith.subf %56, %59 : vector<2x8x8xf32>
    %61 = math.exp %60 : vector<2x8x8xf32>
    %cst_44 = arith.constant dense<0.000000e+00> : vector<2x8xf32>
    %62 = vector.multi_reduction <add>, %61, %cst_44 [2] : vector<2x8x8xf32> to vector<2x8xf32>
    %63 = vector.shape_cast %62 : vector<2x8xf32> to vector<2x8x1xf32>
    %64 = tpu.reciprocal %63 {approx = true} : vector<2x8x1xf32> -> vector<2x8x1xf32>
    %65 = vector.broadcast %64 : vector<2x8x1xf32> to vector<2x8x8xf32>
    %66 = arith.mulf %61, %65 : vector<2x8x8xf32>
    "tpu.trace_start"() <{level = 10 : i32, message = "bqk,bkd->bqd"}> : () -> ()
    %cst_45 = arith.constant dense<0.000000e+00> : vector<2x8x16xf32>
    %67 = tpu.matmul %66, %51, %cst_45 {dimension_numbers = #tpu.dot_dimension_numbers<[2], [1], [1], [2], [0, 0, 0, 1, 1, 2], [0], [0]>} : vector<2x8x8xf32>, vector<2x8x16xf32>, vector<2x8x16xf32> -> vector<2x8x16xf32>
    "tpu.trace_stop"() : () -> ()
    %68 = vector.shape_cast %67 : vector<2x8x16xf32> to vector<16x16xf32>
    %c0_46 = arith.constant 0 : index
    %c0_47 = arith.constant 0 : index
    %c0_48 = arith.constant 0 : index
    %c0_49 = arith.constant 0 : index
    %69 = vector.load %arg11[%c0_46, %c0_47, %c0_48, %c0_49] : memref<2x2x16x32xf32, #tpu.memory_space<vmem>>, vector<1x1x16x32xf32>
    %70 = vector.shape_cast %69 : vector<1x1x16x32xf32> to vector<16x32xf32>
    %cst_50 = arith.constant dense<0.000000e+00> : vector<16x32xf32>
    %71 = tpu.matmul %68, %70, %cst_50 {dimension_numbers = #tpu.dot_dimension_numbers<[1], [0], [0], [1], [0, 0, 1, 1], [], []>} : vector<16x16xf32>, vector<16x32xf32>, vector<16x32xf32> -> vector<16x32xf32>
    %72 = arith.addf %27, %71 : vector<16x32xf32>
    %c0_51 = arith.constant 0 : index
    %c1 = arith.constant 1 : index
    %c0_52 = arith.constant 0 : index
    %c0_53 = arith.constant 0 : index
    %73 = vector.load %arg5[%c0_51, %c1, %c0_52, %c0_53] : memref<2x2x32x16xf32, #tpu.memory_space<vmem>>, vector<1x1x32x16xf32>
    %74 = vector.shape_cast %73 : vector<1x1x32x16xf32> to vector<32x16xf32>
    %cst_54 = arith.constant dense<0.000000e+00> : vector<16x16xf32>
    %75 = tpu.matmul %25, %74, %cst_54 {dimension_numbers = #tpu.dot_dimension_numbers<[1], [0], [0], [1], [0, 0, 1, 1], [], []>} : vector<16x32xf32>, vector<32x16xf32>, vector<16x16xf32> -> vector<16x16xf32>
    %c0_55 = arith.constant 0 : index
    %c1_56 = arith.constant 1 : index
    %c0_57 = arith.constant 0 : index
    %c0_58 = arith.constant 0 : index
    %76 = vector.load %arg6[%c0_55, %c1_56, %c0_57, %c0_58] : memref<2x2x1x16xf32, #tpu.memory_space<vmem>>, vector<1x1x1x16xf32>
    %77 = vector.shape_cast %76 : vector<1x1x1x16xf32> to vector<1x16xf32>
    %78 = vector.broadcast %77 : vector<1x16xf32> to vector<16x16xf32>
    %79 = arith.addf %75, %78 : vector<16x16xf32>
    %80 = vector.shape_cast %79 : vector<16x16xf32> to vector<2x8x16xf32>
    %c0_59 = arith.constant 0 : index
    %c1_60 = arith.constant 1 : index
    %c0_61 = arith.constant 0 : index
    %c0_62 = arith.constant 0 : index
    %81 = vector.load %arg7[%c0_59, %c1_60, %c0_61, %c0_62] : memref<2x2x32x16xf32, #tpu.memory_space<vmem>>, vector<1x1x32x16xf32>
    %82 = vector.shape_cast %81 : vector<1x1x32x16xf32> to vector<32x16xf32>
    %cst_63 = arith.constant dense<0.000000e+00> : vector<16x16xf32>
    %83 = tpu.matmul %25, %82, %cst_63 {dimension_numbers = #tpu.dot_dimension_numbers<[1], [0], [0], [1], [0, 0, 1, 1], [], []>} : vector<16x32xf32>, vector<32x16xf32>, vector<16x16xf32> -> vector<16x16xf32>
    %c0_64 = arith.constant 0 : index
    %c1_65 = arith.constant 1 : index
    %c0_66 = arith.constant 0 : index
    %c0_67 = arith.constant 0 : index
    %84 = vector.load %arg8[%c0_64, %c1_65, %c0_66, %c0_67] : memref<2x2x1x16xf32, #tpu.memory_space<vmem>>, vector<1x1x1x16xf32>
    %85 = vector.shape_cast %84 : vector<1x1x1x16xf32> to vector<1x16xf32>
    %86 = vector.broadcast %85 : vector<1x16xf32> to vector<16x16xf32>
    %87 = arith.addf %83, %86 : vector<16x16xf32>
    %88 = vector.shape_cast %87 : vector<16x16xf32> to vector<2x8x16xf32>
    %c0_68 = arith.constant 0 : index
    %c1_69 = arith.constant 1 : index
    %c0_70 = arith.constant 0 : index
    %c0_71 = arith.constant 0 : index
    %89 = vector.load %arg9[%c0_68, %c1_69, %c0_70, %c0_71] : memref<2x2x32x16xf32, #tpu.memory_space<vmem>>, vector<1x1x32x16xf32>
    %90 = vector.shape_cast %89 : vector<1x1x32x16xf32> to vector<32x16xf32>
    %cst_72 = arith.constant dense<0.000000e+00> : vector<16x16xf32>
    %91 = tpu.matmul %25, %90, %cst_72 {dimension_numbers = #tpu.dot_dimension_numbers<[1], [0], [0], [1], [0, 0, 1, 1], [], []>} : vector<16x32xf32>, vector<32x16xf32>, vector<16x16xf32> -> vector<16x16xf32>
    %c0_73 = arith.constant 0 : index
    %c1_74 = arith.constant 1 : index
    %c0_75 = arith.constant 0 : index
    %c0_76 = arith.constant 0 : index
    %92 = vector.load %arg10[%c0_73, %c1_74, %c0_75, %c0_76] : memref<2x2x1x16xf32, #tpu.memory_space<vmem>>, vector<1x1x1x16xf32>
    %93 = vector.shape_cast %92 : vector<1x1x1x16xf32> to vector<1x16xf32>
    %94 = vector.broadcast %93 : vector<1x16xf32> to vector<16x16xf32>
    %95 = arith.addf %91, %94 : vector<16x16xf32>
    %96 = vector.shape_cast %95 : vector<16x16xf32> to vector<2x8x16xf32>
    "tpu.trace_start"() <{level = 10 : i32, message = "bqd,bkd->bqk"}> : () -> ()
    %cst_77 = arith.constant dense<0.000000e+00> : vector<2x8x8xf32>
    %97 = tpu.matmul %80, %88, %cst_77 {dimension_numbers = #tpu.dot_dimension_numbers<[2], [2], [1], [1], [0, 0, 0, 1, 1, 1], [0], [0]>} : vector<2x8x16xf32>, vector<2x8x16xf32>, vector<2x8x8xf32> -> vector<2x8x8xf32>
    "tpu.trace_stop"() : () -> ()
    %cst_78 = arith.constant 2.500000e-01 : f32
    %98 = vector.broadcast %cst_78 : f32 to vector<2x8x8xf32>
    %99 = arith.mulf %97, %98 : vector<2x8x8xf32>
    %100 = vector.broadcast %26 : vector<2x1x8xf32> to vector<2x8x8xf32>
    %101 = arith.addf %99, %100 : vector<2x8x8xf32>
    %cst_79 = arith.constant dense<0xFF800000> : vector<2x8xf32>
    %102 = vector.multi_reduction <maximumf>, %101, %cst_79 [2] : vector<2x8x8xf32> to vector<2x8xf32>
    %103 = vector.shape_cast %102 : vector<2x8xf32> to vector<2x8x1xf32>
    %104 = vector.broadcast %103 : vector<2x8x1xf32> to vector<2x8x8xf32>
    %105 = arith.subf %101, %104 : vector<2x8x8xf32>
    %106 = math.exp %105 : vector<2x8x8xf32>
    %cst_80 = arith.constant dense<0.000000e+00> : vector<2x8xf32>
    %107 = vector.multi_reduction <add>, %106, %cst_80 [2] : vector<2x8x8xf32> to vector<2x8xf32>
    %108 = vector.shape_cast %107 : vector<2x8xf32> to vector<2x8x1xf32>
    %109 = tpu.reciprocal %108 {approx = true} : vector<2x8x1xf32> -> vector<2x8x1xf32>
    %110 = vector.broadcast %109 : vector<2x8x1xf32> to vector<2x8x8xf32>
    %111 = arith.mulf %106, %110 : vector<2x8x8xf32>
    "tpu.trace_start"() <{level = 10 : i32, message = "bqk,bkd->bqd"}> : () -> ()
    %cst_81 = arith.constant dense<0.000000e+00> : vector<2x8x16xf32>
    %112 = tpu.matmul %111, %96, %cst_81 {dimension_numbers = #tpu.dot_dimension_numbers<[2], [1], [1], [2], [0, 0, 0, 1, 1, 2], [0], [0]>} : vector<2x8x8xf32>, vector<2x8x16xf32>, vector<2x8x16xf32> -> vector<2x8x16xf32>
    "tpu.trace_stop"() : () -> ()
    %113 = vector.shape_cast %112 : vector<2x8x16xf32> to vector<16x16xf32>
    %c0_82 = arith.constant 0 : index
    %c1_83 = arith.constant 1 : index
    %c0_84 = arith.constant 0 : index
    %c0_85 = arith.constant 0 : index
    %114 = vector.load %arg11[%c0_82, %c1_83, %c0_84, %c0_85] : memref<2x2x16x32xf32, #tpu.memory_space<vmem>>, vector<1x1x16x32xf32>
    %115 = vector.shape_cast %114 : vector<1x1x16x32xf32> to vector<16x32xf32>
    %cst_86 = arith.constant dense<0.000000e+00> : vector<16x32xf32>
    %116 = tpu.matmul %113, %115, %cst_86 {dimension_numbers = #tpu.dot_dimension_numbers<[1], [0], [0], [1], [0, 0, 1, 1], [], []>} : vector<16x16xf32>, vector<16x32xf32>, vector<16x32xf32> -> vector<16x32xf32>
    %117 = arith.addf %72, %116 : vector<16x32xf32>
    %118 = arith.addf %25, %117 : vector<16x32xf32>
    %c0_87 = arith.constant 0 : index
    %c0_88 = arith.constant 0 : index
    %c0_89 = arith.constant 0 : index
    %119 = vector.load %arg12[%c0_87, %c0_88, %c0_89] : memref<2x1x32xf32, #tpu.memory_space<vmem>>, vector<1x1x32xf32>
    %120 = vector.shape_cast %119 : vector<1x1x32xf32> to vector<1x32xf32>
    %121 = vector.broadcast %120 : vector<1x32xf32> to vector<16x32xf32>
    %122 = arith.addf %118, %121 : vector<16x32xf32>
    %c0_90 = arith.constant 0 : index
    %c0_91 = arith.constant 0 : index
    %c0_92 = arith.constant 0 : index
    %123 = vector.load %arg13[%c0_90, %c0_91, %c0_92] : memref<2x1x32xf32, #tpu.memory_space<vmem>>, vector<1x1x32xf32>
    %124 = vector.shape_cast %123 : vector<1x1x32xf32> to vector<1x32xf32>
    %c0_93 = arith.constant 0 : index
    %c0_94 = arith.constant 0 : index
    %c0_95 = arith.constant 0 : index
    %125 = vector.load %arg14[%c0_93, %c0_94, %c0_95] : memref<2x1x32xf32, #tpu.memory_space<vmem>>, vector<1x1x32xf32>
    %126 = vector.shape_cast %125 : vector<1x1x32xf32> to vector<1x32xf32>
    %cst_96 = arith.constant dense<0.000000e+00> : vector<16xf32>
    %127 = vector.multi_reduction <add>, %122, %cst_96 [1] : vector<16x32xf32> to vector<16xf32>
    %128 = vector.shape_cast %127 : vector<16xf32> to vector<16x1xf32>
    %cst_97 = arith.constant 3.200000e+01 : f32
    %129 = vector.broadcast %cst_97 : f32 to vector<16x1xf32>
    %130 = arith.divf %128, %129 : vector<16x1xf32>
    %131 = vector.broadcast %130 : vector<16x1xf32> to vector<16x32xf32>
    %132 = arith.subf %122, %131 : vector<16x32xf32>
    %133 = arith.mulf %132, %132 : vector<16x32xf32>
    %cst_98 = arith.constant dense<0.000000e+00> : vector<16xf32>
    %134 = vector.multi_reduction <add>, %133, %cst_98 [1] : vector<16x32xf32> to vector<16xf32>
    %135 = vector.shape_cast %134 : vector<16xf32> to vector<16x1xf32>
    %cst_99 = arith.constant 3.200000e+01 : f32
    %136 = vector.broadcast %cst_99 : f32 to vector<16x1xf32>
    %137 = arith.divf %135, %136 : vector<16x1xf32>
    %138 = vector.broadcast %130 : vector<16x1xf32> to vector<16x32xf32>
    %139 = arith.subf %122, %138 : vector<16x32xf32>
    %cst_100 = arith.constant 9.99999996E-13 : f32
    %140 = vector.broadcast %cst_100 : f32 to vector<16x1xf32>
    %141 = arith.addf %137, %140 : vector<16x1xf32>
    %142 = math.rsqrt %141 : vector<16x1xf32>
    %143 = vector.broadcast %142 : vector<16x1xf32> to vector<16x32xf32>
    %144 = arith.mulf %139, %143 : vector<16x32xf32>
    %145 = vector.broadcast %124 : vector<1x32xf32> to vector<16x32xf32>
    %146 = arith.mulf %144, %145 : vector<16x32xf32>
    %147 = vector.broadcast %126 : vector<1x32xf32> to vector<16x32xf32>
    %148 = arith.addf %146, %147 : vector<16x32xf32>
    %c0_101 = arith.constant 0 : index
    %c0_102 = arith.constant 0 : index
    %c0_103 = arith.constant 0 : index
    %149 = vector.load %arg15[%c0_101, %c0_102, %c0_103] : memref<2x32x64xf32, #tpu.memory_space<vmem>>, vector<1x32x64xf32>
    %150 = vector.shape_cast %149 : vector<1x32x64xf32> to vector<32x64xf32>
    %cst_104 = arith.constant dense<0.000000e+00> : vector<16x64xf32>
    %151 = tpu.matmul %148, %150, %cst_104 {dimension_numbers = #tpu.dot_dimension_numbers<[1], [0], [0], [1], [0, 0, 1, 1], [], []>} : vector<16x32xf32>, vector<32x64xf32>, vector<16x64xf32> -> vector<16x64xf32>
    %c0_105 = arith.constant 0 : index
    %c0_106 = arith.constant 0 : index
    %c0_107 = arith.constant 0 : index
    %152 = vector.load %arg16[%c0_105, %c0_106, %c0_107] : memref<2x1x64xf32, #tpu.memory_space<vmem>>, vector<1x1x64xf32>
    %153 = vector.shape_cast %152 : vector<1x1x64xf32> to vector<1x64xf32>
    %154 = vector.broadcast %153 : vector<1x64xf32> to vector<16x64xf32>
    %155 = arith.addf %151, %154 : vector<16x64xf32>
    %cst_108 = arith.constant 5.000000e-01 : f32
    %156 = vector.broadcast %cst_108 : f32 to vector<16x64xf32>
    %157 = arith.mulf %156, %155 : vector<16x64xf32>
    %cst_109 = arith.constant 4.471500e-02 : f32
    %158 = vector.broadcast %cst_109 : f32 to vector<16x64xf32>
    %159 = arith.mulf %158, %155 : vector<16x64xf32>
    %160 = arith.mulf %159, %155 : vector<16x64xf32>
    %161 = arith.mulf %160, %155 : vector<16x64xf32>
    %162 = arith.addf %155, %161 : vector<16x64xf32>
    %cst_110 = arith.constant 0.797884583 : f32
    %163 = vector.broadcast %cst_110 : f32 to vector<16x64xf32>
    %164 = arith.mulf %163, %162 : vector<16x64xf32>
    %165 = math.tanh %164 : vector<16x64xf32>
    %cst_111 = arith.constant 1.000000e+00 : f32
    %166 = vector.broadcast %cst_111 : f32 to vector<16x64xf32>
    %167 = arith.addf %166, %165 : vector<16x64xf32>
    %168 = arith.mulf %157, %167 : vector<16x64xf32>
    %c0_112 = arith.constant 0 : index
    %c0_113 = arith.constant 0 : index
    %c0_114 = arith.constant 0 : index
    %169 = vector.load %arg17[%c0_112, %c0_113, %c0_114] : memref<2x64x32xf32, #tpu.memory_space<vmem>>, vector<1x64x32xf32>
    %170 = vector.shape_cast %169 : vector<1x64x32xf32> to vector<64x32xf32>
    %cst_115 = arith.constant dense<0.000000e+00> : vector<16x32xf32>
    %171 = tpu.matmul %168, %170, %cst_115 {dimension_numbers = #tpu.dot_dimension_numbers<[1], [0], [0], [1], [0, 0, 1, 1], [], []>} : vector<16x64xf32>, vector<64x32xf32>, vector<16x32xf32> -> vector<16x32xf32>
    %c0_116 = arith.constant 0 : index
    %c0_117 = arith.constant 0 : index
    %c0_118 = arith.constant 0 : index
    %172 = vector.load %arg18[%c0_116, %c0_117, %c0_118] : memref<2x1x32xf32, #tpu.memory_space<vmem>>, vector<1x1x32xf32>
    %173 = vector.shape_cast %172 : vector<1x1x32xf32> to vector<1x32xf32>
    %174 = vector.broadcast %173 : vector<1x32xf32> to vector<16x32xf32>
    %175 = arith.addf %171, %174 : vector<16x32xf32>
    %176 = arith.addf %148, %175 : vector<16x32xf32>
    %c0_119 = arith.constant 0 : index
    %c0_120 = arith.constant 0 : index
    %c0_121 = arith.constant 0 : index
    %177 = vector.load %arg19[%c0_119, %c0_120, %c0_121] : memref<2x1x32xf32, #tpu.memory_space<vmem>>, vector<1x1x32xf32>
    %178 = vector.shape_cast %177 : vector<1x1x32xf32> to vector<1x32xf32>
    %c0_122 = arith.constant 0 : index
    %c0_123 = arith.constant 0 : index
    %c0_124 = arith.constant 0 : index
    %179 = vector.load %arg20[%c0_122, %c0_123, %c0_124] : memref<2x1x32xf32, #tpu.memory_space<vmem>>, vector<1x1x32xf32>
    %180 = vector.shape_cast %179 : vector<1x1x32xf32> to vector<1x32xf32>
    %cst_125 = arith.constant dense<0.000000e+00> : vector<16xf32>
    %181 = vector.multi_reduction <add>, %176, %cst_125 [1] : vector<16x32xf32> to vector<16xf32>
    %182 = vector.shape_cast %181 : vector<16xf32> to vector<16x1xf32>
    %cst_126 = arith.constant 3.200000e+01 : f32
    %183 = vector.broadcast %cst_126 : f32 to vector<16x1xf32>
    %184 = arith.divf %182, %183 : vector<16x1xf32>
    %185 = vector.broadcast %184 : vector<16x1xf32> to vector<16x32xf32>
    %186 = arith.subf %176, %185 : vector<16x32xf32>
    %187 = arith.mulf %186, %186 : vector<16x32xf32>
    %cst_127 = arith.constant dense<0.000000e+00> : vector<16xf32>
    %188 = vector.multi_reduction <add>, %187, %cst_127 [1] : vector<16x32xf32> to vector<16xf32>
    %189 = vector.shape_cast %188 : vector<16xf32> to vector<16x1xf32>
    %cst_128 = arith.constant 3.200000e+01 : f32
    %190 = vector.broadcast %cst_128 : f32 to vector<16x1xf32>
    %191 = arith.divf %189, %190 : vector<16x1xf32>
    %192 = vector.broadcast %184 : vector<16x1xf32> to vector<16x32xf32>
    %193 = arith.subf %176, %192 : vector<16x32xf32>
    %cst_129 = arith.constant 9.99999996E-13 : f32
    %194 = vector.broadcast %cst_129 : f32 to vector<16x1xf32>
    %195 = arith.addf %191, %194 : vector<16x1xf32>
    %196 = math.rsqrt %195 : vector<16x1xf32>
    %197 = vector.broadcast %196 : vector<16x1xf32> to vector<16x32xf32>
    %198 = arith.mulf %193, %197 : vector<16x32xf32>
    %199 = vector.broadcast %178 : vector<1x32xf32> to vector<16x32xf32>
    %200 = arith.mulf %198, %199 : vector<16x32xf32>
    %201 = vector.broadcast %180 : vector<1x32xf32> to vector<16x32xf32>
    %202 = arith.addf %200, %201 : vector<16x32xf32>
    %cst_130 = arith.constant 0.000000e+00 : f32
    %203 = vector.broadcast %cst_130 : f32 to vector<16x32xf32>
    %c1_131 = arith.constant 1 : index
    %c0_132 = arith.constant 0 : index
    %c0_133 = arith.constant 0 : index
    %c0_134 = arith.constant 0 : index
    %204 = vector.load %arg5[%c1_131, %c0_132, %c0_133, %c0_134] : memref<2x2x32x16xf32, #tpu.memory_space<vmem>>, vector<1x1x32x16xf32>
    %205 = vector.shape_cast %204 : vector<1x1x32x16xf32> to vector<32x16xf32>
    %cst_135 = arith.constant dense<0.000000e+00> : vector<16x16xf32>
    %206 = tpu.matmul %202, %205, %cst_135 {dimension_numbers = #tpu.dot_dimension_numbers<[1], [0], [0], [1], [0, 0, 1, 1], [], []>} : vector<16x32xf32>, vector<32x16xf32>, vector<16x16xf32> -> vector<16x16xf32>
    %c1_136 = arith.constant 1 : index
    %c0_137 = arith.constant 0 : index
    %c0_138 = arith.constant 0 : index
    %c0_139 = arith.constant 0 : index
    %207 = vector.load %arg6[%c1_136, %c0_137, %c0_138, %c0_139] : memref<2x2x1x16xf32, #tpu.memory_space<vmem>>, vector<1x1x1x16xf32>
    %208 = vector.shape_cast %207 : vector<1x1x1x16xf32> to vector<1x16xf32>
    %209 = vector.broadcast %208 : vector<1x16xf32> to vector<16x16xf32>
    %210 = arith.addf %206, %209 : vector<16x16xf32>
    %211 = vector.shape_cast %210 : vector<16x16xf32> to vector<2x8x16xf32>
    %c1_140 = arith.constant 1 : index
    %c0_141 = arith.constant 0 : index
    %c0_142 = arith.constant 0 : index
    %c0_143 = arith.constant 0 : index
    %212 = vector.load %arg7[%c1_140, %c0_141, %c0_142, %c0_143] : memref<2x2x32x16xf32, #tpu.memory_space<vmem>>, vector<1x1x32x16xf32>
    %213 = vector.shape_cast %212 : vector<1x1x32x16xf32> to vector<32x16xf32>
    %cst_144 = arith.constant dense<0.000000e+00> : vector<16x16xf32>
    %214 = tpu.matmul %202, %213, %cst_144 {dimension_numbers = #tpu.dot_dimension_numbers<[1], [0], [0], [1], [0, 0, 1, 1], [], []>} : vector<16x32xf32>, vector<32x16xf32>, vector<16x16xf32> -> vector<16x16xf32>
    %c1_145 = arith.constant 1 : index
    %c0_146 = arith.constant 0 : index
    %c0_147 = arith.constant 0 : index
    %c0_148 = arith.constant 0 : index
    %215 = vector.load %arg8[%c1_145, %c0_146, %c0_147, %c0_148] : memref<2x2x1x16xf32, #tpu.memory_space<vmem>>, vector<1x1x1x16xf32>
    %216 = vector.shape_cast %215 : vector<1x1x1x16xf32> to vector<1x16xf32>
    %217 = vector.broadcast %216 : vector<1x16xf32> to vector<16x16xf32>
    %218 = arith.addf %214, %217 : vector<16x16xf32>
    %219 = vector.shape_cast %218 : vector<16x16xf32> to vector<2x8x16xf32>
    %c1_149 = arith.constant 1 : index
    %c0_150 = arith.constant 0 : index
    %c0_151 = arith.constant 0 : index
    %c0_152 = arith.constant 0 : index
    %220 = vector.load %arg9[%c1_149, %c0_150, %c0_151, %c0_152] : memref<2x2x32x16xf32, #tpu.memory_space<vmem>>, vector<1x1x32x16xf32>
    %221 = vector.shape_cast %220 : vector<1x1x32x16xf32> to vector<32x16xf32>
    %cst_153 = arith.constant dense<0.000000e+00> : vector<16x16xf32>
    %222 = tpu.matmul %202, %221, %cst_153 {dimension_numbers = #tpu.dot_dimension_numbers<[1], [0], [0], [1], [0, 0, 1, 1], [], []>} : vector<16x32xf32>, vector<32x16xf32>, vector<16x16xf32> -> vector<16x16xf32>
    %c1_154 = arith.constant 1 : index
    %c0_155 = arith.constant 0 : index
    %c0_156 = arith.constant 0 : index
    %c0_157 = arith.constant 0 : index
    %223 = vector.load %arg10[%c1_154, %c0_155, %c0_156, %c0_157] : memref<2x2x1x16xf32, #tpu.memory_space<vmem>>, vector<1x1x1x16xf32>
    %224 = vector.shape_cast %223 : vector<1x1x1x16xf32> to vector<1x16xf32>
    %225 = vector.broadcast %224 : vector<1x16xf32> to vector<16x16xf32>
    %226 = arith.addf %222, %225 : vector<16x16xf32>
    %227 = vector.shape_cast %226 : vector<16x16xf32> to vector<2x8x16xf32>
    "tpu.trace_start"() <{level = 10 : i32, message = "bqd,bkd->bqk"}> : () -> ()
    %cst_158 = arith.constant dense<0.000000e+00> : vector<2x8x8xf32>
    %228 = tpu.matmul %211, %219, %cst_158 {dimension_numbers = #tpu.dot_dimension_numbers<[2], [2], [1], [1], [0, 0, 0, 1, 1, 1], [0], [0]>} : vector<2x8x16xf32>, vector<2x8x16xf32>, vector<2x8x8xf32> -> vector<2x8x8xf32>
    "tpu.trace_stop"() : () -> ()
    %cst_159 = arith.constant 2.500000e-01 : f32
    %229 = vector.broadcast %cst_159 : f32 to vector<2x8x8xf32>
    %230 = arith.mulf %228, %229 : vector<2x8x8xf32>
    %231 = vector.broadcast %26 : vector<2x1x8xf32> to vector<2x8x8xf32>
    %232 = arith.addf %230, %231 : vector<2x8x8xf32>
    %cst_160 = arith.constant dense<0xFF800000> : vector<2x8xf32>
    %233 = vector.multi_reduction <maximumf>, %232, %cst_160 [2] : vector<2x8x8xf32> to vector<2x8xf32>
    %234 = vector.shape_cast %233 : vector<2x8xf32> to vector<2x8x1xf32>
    %235 = vector.broadcast %234 : vector<2x8x1xf32> to vector<2x8x8xf32>
    %236 = arith.subf %232, %235 : vector<2x8x8xf32>
    %237 = math.exp %236 : vector<2x8x8xf32>
    %cst_161 = arith.constant dense<0.000000e+00> : vector<2x8xf32>
    %238 = vector.multi_reduction <add>, %237, %cst_161 [2] : vector<2x8x8xf32> to vector<2x8xf32>
    %239 = vector.shape_cast %238 : vector<2x8xf32> to vector<2x8x1xf32>
    %240 = tpu.reciprocal %239 {approx = true} : vector<2x8x1xf32> -> vector<2x8x1xf32>
    %241 = vector.broadcast %240 : vector<2x8x1xf32> to vector<2x8x8xf32>
    %242 = arith.mulf %237, %241 : vector<2x8x8xf32>
    "tpu.trace_start"() <{level = 10 : i32, message = "bqk,bkd->bqd"}> : () -> ()
    %cst_162 = arith.constant dense<0.000000e+00> : vector<2x8x16xf32>
    %243 = tpu.matmul %242, %227, %cst_162 {dimension_numbers = #tpu.dot_dimension_numbers<[2], [1], [1], [2], [0, 0, 0, 1, 1, 2], [0], [0]>} : vector<2x8x8xf32>, vector<2x8x16xf32>, vector<2x8x16xf32> -> vector<2x8x16xf32>
    "tpu.trace_stop"() : () -> ()
    %244 = vector.shape_cast %243 : vector<2x8x16xf32> to vector<16x16xf32>
    %c1_163 = arith.constant 1 : index
    %c0_164 = arith.constant 0 : index
    %c0_165 = arith.constant 0 : index
    %c0_166 = arith.constant 0 : index
    %245 = vector.load %arg11[%c1_163, %c0_164, %c0_165, %c0_166] : memref<2x2x16x32xf32, #tpu.memory_space<vmem>>, vector<1x1x16x32xf32>
    %246 = vector.shape_cast %245 : vector<1x1x16x32xf32> to vector<16x32xf32>
    %cst_167 = arith.constant dense<0.000000e+00> : vector<16x32xf32>
    %247 = tpu.matmul %244, %246, %cst_167 {dimension_numbers = #tpu.dot_dimension_numbers<[1], [0], [0], [1], [0, 0, 1, 1], [], []>} : vector<16x16xf32>, vector<16x32xf32>, vector<16x32xf32> -> vector<16x32xf32>
    %248 = arith.addf %203, %247 : vector<16x32xf32>
    %c1_168 = arith.constant 1 : index
    %c1_169 = arith.constant 1 : index
    %c0_170 = arith.constant 0 : index
    %c0_171 = arith.constant 0 : index
    %249 = vector.load %arg5[%c1_168, %c1_169, %c0_170, %c0_171] : memref<2x2x32x16xf32, #tpu.memory_space<vmem>>, vector<1x1x32x16xf32>
    %250 = vector.shape_cast %249 : vector<1x1x32x16xf32> to vector<32x16xf32>
    %cst_172 = arith.constant dense<0.000000e+00> : vector<16x16xf32>
    %251 = tpu.matmul %202, %250, %cst_172 {dimension_numbers = #tpu.dot_dimension_numbers<[1], [0], [0], [1], [0, 0, 1, 1], [], []>} : vector<16x32xf32>, vector<32x16xf32>, vector<16x16xf32> -> vector<16x16xf32>
    %c1_173 = arith.constant 1 : index
    %c1_174 = arith.constant 1 : index
    %c0_175 = arith.constant 0 : index
    %c0_176 = arith.constant 0 : index
    %252 = vector.load %arg6[%c1_173, %c1_174, %c0_175, %c0_176] : memref<2x2x1x16xf32, #tpu.memory_space<vmem>>, vector<1x1x1x16xf32>
    %253 = vector.shape_cast %252 : vector<1x1x1x16xf32> to vector<1x16xf32>
    %254 = vector.broadcast %253 : vector<1x16xf32> to vector<16x16xf32>
    %255 = arith.addf %251, %254 : vector<16x16xf32>
    %256 = vector.shape_cast %255 : vector<16x16xf32> to vector<2x8x16xf32>
    %c1_177 = arith.constant 1 : index
    %c1_178 = arith.constant 1 : index
    %c0_179 = arith.constant 0 : index
    %c0_180 = arith.constant 0 : index
    %257 = vector.load %arg7[%c1_177, %c1_178, %c0_179, %c0_180] : memref<2x2x32x16xf32, #tpu.memory_space<vmem>>, vector<1x1x32x16xf32>
    %258 = vector.shape_cast %257 : vector<1x1x32x16xf32> to vector<32x16xf32>
    %cst_181 = arith.constant dense<0.000000e+00> : vector<16x16xf32>
    %259 = tpu.matmul %202, %258, %cst_181 {dimension_numbers = #tpu.dot_dimension_numbers<[1], [0], [0], [1], [0, 0, 1, 1], [], []>} : vector<16x32xf32>, vector<32x16xf32>, vector<16x16xf32> -> vector<16x16xf32>
    %c1_182 = arith.constant 1 : index
    %c1_183 = arith.constant 1 : index
    %c0_184 = arith.constant 0 : index
    %c0_185 = arith.constant 0 : index
    %260 = vector.load %arg8[%c1_182, %c1_183, %c0_184, %c0_185] : memref<2x2x1x16xf32, #tpu.memory_space<vmem>>, vector<1x1x1x16xf32>
    %261 = vector.shape_cast %260 : vector<1x1x1x16xf32> to vector<1x16xf32>
    %262 = vector.broadcast %261 : vector<1x16xf32> to vector<16x16xf32>
    %263 = arith.addf %259, %262 : vector<16x16xf32>
    %264 = vector.shape_cast %263 : vector<16x16xf32> to vector<2x8x16xf32>
    %c1_186 = arith.constant 1 : index
    %c1_187 = arith.constant 1 : index
    %c0_188 = arith.constant 0 : index
    %c0_189 = arith.constant 0 : index
    %265 = vector.load %arg9[%c1_186, %c1_187, %c0_188, %c0_189] : memref<2x2x32x16xf32, #tpu.memory_space<vmem>>, vector<1x1x32x16xf32>
    %266 = vector.shape_cast %265 : vector<1x1x32x16xf32> to vector<32x16xf32>
    %cst_190 = arith.constant dense<0.000000e+00> : vector<16x16xf32>
    %267 = tpu.matmul %202, %266, %cst_190 {dimension_numbers = #tpu.dot_dimension_numbers<[1], [0], [0], [1], [0, 0, 1, 1], [], []>} : vector<16x32xf32>, vector<32x16xf32>, vector<16x16xf32> -> vector<16x16xf32>
    %c1_191 = arith.constant 1 : index
    %c1_192 = arith.constant 1 : index
    %c0_193 = arith.constant 0 : index
    %c0_194 = arith.constant 0 : index
    %268 = vector.load %arg10[%c1_191, %c1_192, %c0_193, %c0_194] : memref<2x2x1x16xf32, #tpu.memory_space<vmem>>, vector<1x1x1x16xf32>
    %269 = vector.shape_cast %268 : vector<1x1x1x16xf32> to vector<1x16xf32>
    %270 = vector.broadcast %269 : vector<1x16xf32> to vector<16x16xf32>
    %271 = arith.addf %267, %270 : vector<16x16xf32>
    %272 = vector.shape_cast %271 : vector<16x16xf32> to vector<2x8x16xf32>
    "tpu.trace_start"() <{level = 10 : i32, message = "bqd,bkd->bqk"}> : () -> ()
    %cst_195 = arith.constant dense<0.000000e+00> : vector<2x8x8xf32>
    %273 = tpu.matmul %256, %264, %cst_195 {dimension_numbers = #tpu.dot_dimension_numbers<[2], [2], [1], [1], [0, 0, 0, 1, 1, 1], [0], [0]>} : vector<2x8x16xf32>, vector<2x8x16xf32>, vector<2x8x8xf32> -> vector<2x8x8xf32>
    "tpu.trace_stop"() : () -> ()
    %cst_196 = arith.constant 2.500000e-01 : f32
    %274 = vector.broadcast %cst_196 : f32 to vector<2x8x8xf32>
    %275 = arith.mulf %273, %274 : vector<2x8x8xf32>
    %276 = vector.broadcast %26 : vector<2x1x8xf32> to vector<2x8x8xf32>
    %277 = arith.addf %275, %276 : vector<2x8x8xf32>
    %cst_197 = arith.constant dense<0xFF800000> : vector<2x8xf32>
    %278 = vector.multi_reduction <maximumf>, %277, %cst_197 [2] : vector<2x8x8xf32> to vector<2x8xf32>
    %279 = vector.shape_cast %278 : vector<2x8xf32> to vector<2x8x1xf32>
    %280 = vector.broadcast %279 : vector<2x8x1xf32> to vector<2x8x8xf32>
    %281 = arith.subf %277, %280 : vector<2x8x8xf32>
    %282 = math.exp %281 : vector<2x8x8xf32>
    %cst_198 = arith.constant dense<0.000000e+00> : vector<2x8xf32>
    %283 = vector.multi_reduction <add>, %282, %cst_198 [2] : vector<2x8x8xf32> to vector<2x8xf32>
    %284 = vector.shape_cast %283 : vector<2x8xf32> to vector<2x8x1xf32>
    %285 = tpu.reciprocal %284 {approx = true} : vector<2x8x1xf32> -> vector<2x8x1xf32>
    %286 = vector.broadcast %285 : vector<2x8x1xf32> to vector<2x8x8xf32>
    %287 = arith.mulf %282, %286 : vector<2x8x8xf32>
    "tpu.trace_start"() <{level = 10 : i32, message = "bqk,bkd->bqd"}> : () -> ()
    %cst_199 = arith.constant dense<0.000000e+00> : vector<2x8x16xf32>
    %288 = tpu.matmul %287, %272, %cst_199 {dimension_numbers = #tpu.dot_dimension_numbers<[2], [1], [1], [2], [0, 0, 0, 1, 1, 2], [0], [0]>} : vector<2x8x8xf32>, vector<2x8x16xf32>, vector<2x8x16xf32> -> vector<2x8x16xf32>
    "tpu.trace_stop"() : () -> ()
    %289 = vector.shape_cast %288 : vector<2x8x16xf32> to vector<16x16xf32>
    %c1_200 = arith.constant 1 : index
    %c1_201 = arith.constant 1 : index
    %c0_202 = arith.constant 0 : index
    %c0_203 = arith.constant 0 : index
    %290 = vector.load %arg11[%c1_200, %c1_201, %c0_202, %c0_203] : memref<2x2x16x32xf32, #tpu.memory_space<vmem>>, vector<1x1x16x32xf32>
    %291 = vector.shape_cast %290 : vector<1x1x16x32xf32> to vector<16x32xf32>
    %cst_204 = arith.constant dense<0.000000e+00> : vector<16x32xf32>
    %292 = tpu.matmul %289, %291, %cst_204 {dimension_numbers = #tpu.dot_dimension_numbers<[1], [0], [0], [1], [0, 0, 1, 1], [], []>} : vector<16x16xf32>, vector<16x32xf32>, vector<16x32xf32> -> vector<16x32xf32>
    %293 = arith.addf %248, %292 : vector<16x32xf32>
    %294 = arith.addf %202, %293 : vector<16x32xf32>
    %c1_205 = arith.constant 1 : index
    %c0_206 = arith.constant 0 : index
    %c0_207 = arith.constant 0 : index
    %295 = vector.load %arg12[%c1_205, %c0_206, %c0_207] : memref<2x1x32xf32, #tpu.memory_space<vmem>>, vector<1x1x32xf32>
    %296 = vector.shape_cast %295 : vector<1x1x32xf32> to vector<1x32xf32>
    %297 = vector.broadcast %296 : vector<1x32xf32> to vector<16x32xf32>
    %298 = arith.addf %294, %297 : vector<16x32xf32>
    %c1_208 = arith.constant 1 : index
    %c0_209 = arith.constant 0 : index
    %c0_210 = arith.constant 0 : index
    %299 = vector.load %arg13[%c1_208, %c0_209, %c0_210] : memref<2x1x32xf32, #tpu.memory_space<vmem>>, vector<1x1x32xf32>
    %300 = vector.shape_cast %299 : vector<1x1x32xf32> to vector<1x32xf32>
    %c1_211 = arith.constant 1 : index
    %c0_212 = arith.constant 0 : index
    %c0_213 = arith.constant 0 : index
    %301 = vector.load %arg14[%c1_211, %c0_212, %c0_213] : memref<2x1x32xf32, #tpu.memory_space<vmem>>, vector<1x1x32xf32>
    %302 = vector.shape_cast %301 : vector<1x1x32xf32> to vector<1x32xf32>
    %cst_214 = arith.constant dense<0.000000e+00> : vector<16xf32>
    %303 = vector.multi_reduction <add>, %298, %cst_214 [1] : vector<16x32xf32> to vector<16xf32>
    %304 = vector.shape_cast %303 : vector<16xf32> to vector<16x1xf32>
    %cst_215 = arith.constant 3.200000e+01 : f32
    %305 = vector.broadcast %cst_215 : f32 to vector<16x1xf32>
    %306 = arith.divf %304, %305 : vector<16x1xf32>
    %307 = vector.broadcast %306 : vector<16x1xf32> to vector<16x32xf32>
    %308 = arith.subf %298, %307 : vector<16x32xf32>
    %309 = arith.mulf %308, %308 : vector<16x32xf32>
    %cst_216 = arith.constant dense<0.000000e+00> : vector<16xf32>
    %310 = vector.multi_reduction <add>, %309, %cst_216 [1] : vector<16x32xf32> to vector<16xf32>
    %311 = vector.shape_cast %310 : vector<16xf32> to vector<16x1xf32>
    %cst_217 = arith.constant 3.200000e+01 : f32
    %312 = vector.broadcast %cst_217 : f32 to vector<16x1xf32>
    %313 = arith.divf %311, %312 : vector<16x1xf32>
    %314 = vector.broadcast %306 : vector<16x1xf32> to vector<16x32xf32>
    %315 = arith.subf %298, %314 : vector<16x32xf32>
    %cst_218 = arith.constant 9.99999996E-13 : f32
    %316 = vector.broadcast %cst_218 : f32 to vector<16x1xf32>
    %317 = arith.addf %313, %316 : vector<16x1xf32>
    %318 = math.rsqrt %317 : vector<16x1xf32>
    %319 = vector.broadcast %318 : vector<16x1xf32> to vector<16x32xf32>
    %320 = arith.mulf %315, %319 : vector<16x32xf32>
    %321 = vector.broadcast %300 : vector<1x32xf32> to vector<16x32xf32>
    %322 = arith.mulf %320, %321 : vector<16x32xf32>
    %323 = vector.broadcast %302 : vector<1x32xf32> to vector<16x32xf32>
    %324 = arith.addf %322, %323 : vector<16x32xf32>
    %c1_219 = arith.constant 1 : index
    %c0_220 = arith.constant 0 : index
    %c0_221 = arith.constant 0 : index
    %325 = vector.load %arg15[%c1_219, %c0_220, %c0_221] : memref<2x32x64xf32, #tpu.memory_space<vmem>>, vector<1x32x64xf32>
    %326 = vector.shape_cast %325 : vector<1x32x64xf32> to vector<32x64xf32>
    %cst_222 = arith.constant dense<0.000000e+00> : vector<16x64xf32>
    %327 = tpu.matmul %324, %326, %cst_222 {dimension_numbers = #tpu.dot_dimension_numbers<[1], [0], [0], [1], [0, 0, 1, 1], [], []>} : vector<16x32xf32>, vector<32x64xf32>, vector<16x64xf32> -> vector<16x64xf32>
    %c1_223 = arith.constant 1 : index
    %c0_224 = arith.constant 0 : index
    %c0_225 = arith.constant 0 : index
    %328 = vector.load %arg16[%c1_223, %c0_224, %c0_225] : memref<2x1x64xf32, #tpu.memory_space<vmem>>, vector<1x1x64xf32>
    %329 = vector.shape_cast %328 : vector<1x1x64xf32> to vector<1x64xf32>
    %330 = vector.broadcast %329 : vector<1x64xf32> to vector<16x64xf32>
    %331 = arith.addf %327, %330 : vector<16x64xf32>
    %cst_226 = arith.constant 5.000000e-01 : f32
    %332 = vector.broadcast %cst_226 : f32 to vector<16x64xf32>
    %333 = arith.mulf %332, %331 : vector<16x64xf32>
    %cst_227 = arith.constant 4.471500e-02 : f32
    %334 = vector.broadcast %cst_227 : f32 to vector<16x64xf32>
    %335 = arith.mulf %334, %331 : vector<16x64xf32>
    %336 = arith.mulf %335, %331 : vector<16x64xf32>
    %337 = arith.mulf %336, %331 : vector<16x64xf32>
    %338 = arith.addf %331, %337 : vector<16x64xf32>
    %cst_228 = arith.constant 0.797884583 : f32
    %339 = vector.broadcast %cst_228 : f32 to vector<16x64xf32>
    %340 = arith.mulf %339, %338 : vector<16x64xf32>
    %341 = math.tanh %340 : vector<16x64xf32>
    %cst_229 = arith.constant 1.000000e+00 : f32
    %342 = vector.broadcast %cst_229 : f32 to vector<16x64xf32>
    %343 = arith.addf %342, %341 : vector<16x64xf32>
    %344 = arith.mulf %333, %343 : vector<16x64xf32>
    %c1_230 = arith.constant 1 : index
    %c0_231 = arith.constant 0 : index
    %c0_232 = arith.constant 0 : index
    %345 = vector.load %arg17[%c1_230, %c0_231, %c0_232] : memref<2x64x32xf32, #tpu.memory_space<vmem>>, vector<1x64x32xf32>
    %346 = vector.shape_cast %345 : vector<1x64x32xf32> to vector<64x32xf32>
    %cst_233 = arith.constant dense<0.000000e+00> : vector<16x32xf32>
    %347 = tpu.matmul %344, %346, %cst_233 {dimension_numbers = #tpu.dot_dimension_numbers<[1], [0], [0], [1], [0, 0, 1, 1], [], []>} : vector<16x64xf32>, vector<64x32xf32>, vector<16x32xf32> -> vector<16x32xf32>
    %c1_234 = arith.constant 1 : index
    %c0_235 = arith.constant 0 : index
    %c0_236 = arith.constant 0 : index
    %348 = vector.load %arg18[%c1_234, %c0_235, %c0_236] : memref<2x1x32xf32, #tpu.memory_space<vmem>>, vector<1x1x32xf32>
    %349 = vector.shape_cast %348 : vector<1x1x32xf32> to vector<1x32xf32>
    %350 = vector.broadcast %349 : vector<1x32xf32> to vector<16x32xf32>
    %351 = arith.addf %347, %350 : vector<16x32xf32>
    %352 = arith.addf %324, %351 : vector<16x32xf32>
    %c1_237 = arith.constant 1 : index
    %c0_238 = arith.constant 0 : index
    %c0_239 = arith.constant 0 : index
    %353 = vector.load %arg19[%c1_237, %c0_238, %c0_239] : memref<2x1x32xf32, #tpu.memory_space<vmem>>, vector<1x1x32xf32>
    %354 = vector.shape_cast %353 : vector<1x1x32xf32> to vector<1x32xf32>
    %c1_240 = arith.constant 1 : index
    %c0_241 = arith.constant 0 : index
    %c0_242 = arith.constant 0 : index
    %355 = vector.load %arg20[%c1_240, %c0_241, %c0_242] : memref<2x1x32xf32, #tpu.memory_space<vmem>>, vector<1x1x32xf32>
    %356 = vector.shape_cast %355 : vector<1x1x32xf32> to vector<1x32xf32>
    %cst_243 = arith.constant dense<0.000000e+00> : vector<16xf32>
    %357 = vector.multi_reduction <add>, %352, %cst_243 [1] : vector<16x32xf32> to vector<16xf32>
    %358 = vector.shape_cast %357 : vector<16xf32> to vector<16x1xf32>
    %cst_244 = arith.constant 3.200000e+01 : f32
    %359 = vector.broadcast %cst_244 : f32 to vector<16x1xf32>
    %360 = arith.divf %358, %359 : vector<16x1xf32>
    %361 = vector.broadcast %360 : vector<16x1xf32> to vector<16x32xf32>
    %362 = arith.subf %352, %361 : vector<16x32xf32>
    %363 = arith.mulf %362, %362 : vector<16x32xf32>
    %cst_245 = arith.constant dense<0.000000e+00> : vector<16xf32>
    %364 = vector.multi_reduction <add>, %363, %cst_245 [1] : vector<16x32xf32> to vector<16xf32>
    %365 = vector.shape_cast %364 : vector<16xf32> to vector<16x1xf32>
    %cst_246 = arith.constant 3.200000e+01 : f32
    %366 = vector.broadcast %cst_246 : f32 to vector<16x1xf32>
    %367 = arith.divf %365, %366 : vector<16x1xf32>
    %368 = vector.broadcast %360 : vector<16x1xf32> to vector<16x32xf32>
    %369 = arith.subf %352, %368 : vector<16x32xf32>
    %cst_247 = arith.constant 9.99999996E-13 : f32
    %370 = vector.broadcast %cst_247 : f32 to vector<16x1xf32>
    %371 = arith.addf %367, %370 : vector<16x1xf32>
    %372 = math.rsqrt %371 : vector<16x1xf32>
    %373 = vector.broadcast %372 : vector<16x1xf32> to vector<16x32xf32>
    %374 = arith.mulf %369, %373 : vector<16x32xf32>
    %375 = vector.broadcast %354 : vector<1x32xf32> to vector<16x32xf32>
    %376 = arith.mulf %374, %375 : vector<16x32xf32>
    %377 = vector.broadcast %356 : vector<1x32xf32> to vector<16x32xf32>
    %378 = arith.addf %376, %377 : vector<16x32xf32>
    %c0_248 = arith.constant 0 : index
    %c0_249 = arith.constant 0 : index
    %379 = vector.load %arg27[%c0_248, %c0_249] : memref<16x32xf32, #tpu.memory_space<vmem>>, vector<16x32xf32>
    tpu.vector_store %arg27[%c0_248, %c0_249], %378 {strides = array<i32>} : memref<16x32xf32, #tpu.memory_space<vmem>>, vector<16x32xf32>,
    %380 = vector.extract_strided_slice %378 {offsets = [0, 0], sizes = [1, 32], strides = [1, 1]} : vector<16x32xf32> to vector<1x32xf32>
    %381 = vector.extract_strided_slice %378 {offsets = [8, 0], sizes = [1, 32], strides = [1, 1]} : vector<16x32xf32> to vector<1x32xf32>
    %382 = tpu.concatenate %380, %381 in 0 : vector<1x32xf32>, vector<1x32xf32> -> vector<2x32xf32>
    %c0_250 = arith.constant 0 : index
    %c0_251 = arith.constant 0 : index
    %383 = vector.load %arg21[%c0_250, %c0_251] : memref<32x5xf32, #tpu.memory_space<vmem>>, vector<32x5xf32>
    %cst_252 = arith.constant dense<0.000000e+00> : vector<2x5xf32>
    %384 = tpu.matmul %382, %383, %cst_252 {dimension_numbers = #tpu.dot_dimension_numbers<[1], [0], [0], [1], [0, 0, 1, 1], [], []>} : vector<2x32xf32>, vector<32x5xf32>, vector<2x5xf32> -> vector<2x5xf32>
    %c0_253 = arith.constant 0 : index
    %c0_254 = arith.constant 0 : index
    %385 = vector.load %arg22[%c0_253, %c0_254] : memref<1x5xf32, #tpu.memory_space<vmem>>, vector<1x5xf32>
    %386 = vector.broadcast %385 : vector<1x5xf32> to vector<2x5xf32>
    %387 = arith.addf %384, %386 : vector<2x5xf32>
    %c0_255 = arith.constant 0 : index
    %c0_256 = arith.constant 0 : index
    %388 = vector.load %arg25[%c0_255, %c0_256] : memref<2x5xf32, #tpu.memory_space<vmem>>, vector<2x5xf32>
    tpu.vector_store %arg25[%c0_255, %c0_256], %387 {strides = array<i32>} : memref<2x5xf32, #tpu.memory_space<vmem>>, vector<2x5xf32>,
    %c0_257 = arith.constant 0 : index
    %c0_258 = arith.constant 0 : index
    %389 = memref.load %arg0[%c0_257, %c0_258] : memref<2x2xi32, #tpu.memory_space<smem>>
    %c0_i32 = arith.constant 0 : i32
    %390 = arith.addi %c0_i32, %389 : i32
    %391 = arith.index_cast %390 : i32 to index
    %c0_259 = arith.constant 0 : index
    %392 = vector.load %arg27[%391, %c0_259] : memref<16x32xf32, #tpu.memory_space<vmem>>, vector<1x32xf32>
    %c0_260 = arith.constant 0 : index
    %c1_261 = arith.constant 1 : index
    %393 = memref.load %arg0[%c0_260, %c1_261] : memref<2x2xi32, #tpu.memory_space<smem>>
    %c0_i32_262 = arith.constant 0 : i32
    %394 = arith.addi %c0_i32_262, %393 : i32
    %395 = arith.index_cast %394 : i32 to index
    %c0_263 = arith.constant 0 : index
    %396 = vector.load %arg27[%395, %c0_263] : memref<16x32xf32, #tpu.memory_space<vmem>>, vector<1x32xf32>
    %c1_264 = arith.constant 1 : index
    %c0_265 = arith.constant 0 : index
    %397 = memref.load %arg0[%c1_264, %c0_265] : memref<2x2xi32, #tpu.memory_space<smem>>
    %c8_i32 = arith.constant 8 : i32
    %398 = arith.addi %c8_i32, %397 : i32
    %399 = arith.index_cast %398 : i32 to index
    %c0_266 = arith.constant 0 : index
    %400 = vector.load %arg27[%399, %c0_266] : memref<16x32xf32, #tpu.memory_space<vmem>>, vector<1x32xf32>
    %c1_267 = arith.constant 1 : index
    %c1_268 = arith.constant 1 : index
    %401 = memref.load %arg0[%c1_267, %c1_268] : memref<2x2xi32, #tpu.memory_space<smem>>
    %c8_i32_269 = arith.constant 8 : i32
    %402 = arith.addi %c8_i32_269, %401 : i32
    %403 = arith.index_cast %402 : i32 to index
    %c0_270 = arith.constant 0 : index
    %404 = vector.load %arg27[%403, %c0_270] : memref<16x32xf32, #tpu.memory_space<vmem>>, vector<1x32xf32>
    %405 = tpu.concatenate %392, %396, %400, %404 in 0 : vector<1x32xf32>, vector<1x32xf32>, vector<1x32xf32>, vector<1x32xf32> -> vector<4x32xf32>
    %c0_271 = arith.constant 0 : index
    %c0_272 = arith.constant 0 : index
    %406 = vector.load %arg23[%c0_271, %c0_272] : memref<32x32xf32, #tpu.memory_space<vmem>>, vector<32x32xf32>
    %cst_273 = arith.constant dense<0.000000e+00> : vector<4x32xf32>
    %407 = tpu.matmul %405, %406, %cst_273 {dimension_numbers = #tpu.dot_dimension_numbers<[1], [0], [0], [1], [0, 0, 1, 1], [], []>} : vector<4x32xf32>, vector<32x32xf32>, vector<4x32xf32> -> vector<4x32xf32>
    %c0_274 = arith.constant 0 : index
    %c0_275 = arith.constant 0 : index
    %408 = vector.load %arg24[%c0_274, %c0_275] : memref<1x32xf32, #tpu.memory_space<vmem>>, vector<1x32xf32>
    %409 = vector.broadcast %408 : vector<1x32xf32> to vector<4x32xf32>
    %410 = arith.addf %407, %409 : vector<4x32xf32>
    %c0_276 = arith.constant 0 : index
    %c0_277 = arith.constant 0 : index
    %411 = vector.load %arg26[%c0_276, %c0_277] : memref<4x32xf32, #tpu.memory_space<vmem>>, vector<4x32xf32>
    tpu.vector_store %arg26[%c0_276, %c0_277], %410 {strides = array<i32>} : memref<4x32xf32, #tpu.memory_space<vmem>>, vector<4x32xf32>,
    return
  }
}

</mosaic_0001>

<bundles_post_ra>
// kernel: tpu_custom_call.1
= control target key start
LH: loop header
LB: loop body
LE: loop exit
PB: predicated region body
PF: predicated region fallthrough
CT: control target
= control target key end

     0   :  { %s2794_s0 = inlined_call_operand.vmem [shape: s32[2,2], index: 0, kind: input, shape index: {}]   ;;  %s2795_s1 = inlined_call_operand.vmem [shape: f32[2,8,32], index: 1, kind: input, shape index: {}]   ;;  %s2796_s2 = inlined_call_operand.vmem [shape: f32[2,1,8], index: 2, kind: input, shape index: {}]   ;;  %s2797_s3 = inlined_call_operand.vmem [shape: f32[1,32], index: 3, kind: input, shape index: {}]   ;;  %s2798_s4 = inlined_call_operand.vmem [shape: f32[1,32], index: 4, kind: input, shape index: {}]   ;;  %s2799_s5 = inlined_call_operand.vmem [shape: f32[2,2,32,16], index: 5, kind: input, shape index: {}]   ;;  %s2800_s6 = inlined_call_operand.vmem [shape: f32[2,2,1,16], index: 6, kind: input, shape index: {}]   ;;  %s2801_s7 = inlined_call_operand.vmem [shape: f32[2,2,32,16], index: 7, kind: input, shape index: {}]   ;;  %s2802_s8 = inlined_call_operand.vmem [shape: f32[2,2,1,16], index: 8, kind: input, shape index: {}]   ;;  %s2803_s9 = inlined_call_operand.vmem [shape: f32[2,2,32,16], index: 9, kind: input, shape index: {}]   ;;  %s2804_s10 = inlined_call_operand.vmem [shape: f32[2,2,1,16], index: 10, kind: input, shape index: {}]   ;;  %s2805_s11 = inlined_call_operand.vmem [shape: f32[2,2,16,32], index: 11, kind: input, shape index: {}]   ;;  %s2806_s12 = inlined_call_operand.vmem [shape: f32[2,1,32], index: 12, kind: input, shape index: {}]   ;;  %s2807_s13 = inlined_call_operand.vmem [shape: f32[2,1,32], index: 13, kind: input, shape index: {}]   ;;  %s2808_s14 = inlined_call_operand.vmem [shape: f32[2,1,32], index: 14, kind: input, shape index: {}]   ;;  %s2809_s15 = inlined_call_operand.vmem [shape: f32[2,32,64], index: 15, kind: input, shape index: {}]   ;;  %s2810_s16 = inlined_call_operand.vmem [shape: f32[2,1,64], index: 16, kind: input, shape index: {}]   ;;  %s2811_s17 = inlined_call_operand.vmem [shape: f32[2,64,32], index: 17, kind: input, shape index: {}]   ;;  %s2812_s18 = inlined_call_operand.vmem [shape: f32[2,1,32], index: 18, kind: input, shape index: {}]   ;;  %s2813_s19 = inlined_call_operand.vmem [shape: f32[2,1,32], index: 19, kind: input, shape index: {}]   ;;  %s2814_s20 = inlined_call_operand.vmem [shape: f32[2,1,32], index: 20, kind: input, shape index: {}]   ;;  %s2815_s21 = inlined_call_operand.vmem [shape: f32[32,5], index: 21, kind: input, shape index: {}]   ;;  %s2816_s22 = inlined_call_operand.vmem [shape: f32[1,5], index: 22, kind: input, shape index: {}]   ;;  %s2817_s23 = inlined_call_operand.vmem [shape: f32[32,32], index: 23, kind: input, shape index: {}]   ;;  %s2818_s24 = inlined_call_operand.vmem [shape: f32[1,32], index: 24, kind: input, shape index: {}]   ;;  %s2819_s25 = inlined_call_operand.hbm [shape: f32[2,5], index: 25, kind: output, shape index: {0}]   ;;  %s2820_s26 = inlined_call_operand.hbm [shape: f32[4,32], index: 26, kind: output, shape index: {1}]  }
   0x1   :  { %2829 = sst [smem:[#allocation12_spill]] %s2794_s0 }
   0x2   :  { %2830 = sst [smem:[#allocation13_spill]] %s2795_s1 }
   0x3   :  { %2831 = sst [smem:[#allocation14_spill]] %s2796_s2 }
   0x4   :  { %2832 = sst [smem:[#allocation15_spill]] %s2797_s3 }
   0x5   :  { %2833 = sst [smem:[#allocation16_spill]] %s2798_s4 }
   0x6   :  { %2834 = sst [smem:[#allocation17_spill]] %s2799_s5 }
   0x7   :  { %2835 = sst [smem:[#allocation18_spill]] %s2800_s6 }
   0x8   :  { %2836 = sst [smem:[#allocation19_spill]] %s2801_s7 }
   0x9   :  { %2837 = sst [smem:[#allocation20_spill]] %s2802_s8 }
   0xa   :  { %2838 = sst [smem:[#allocation21_spill]] %s2803_s9 }
   0xb   :  { %2839 = sst [smem:[#allocation22_spill]] %s2804_s10 }
   0xc   :  { %2840 = sst [smem:[#allocation23_spill]] %s2820_s26 }
   0xd   :  { %32 = vsyncpa [#allocation5], 0 }
   0xe   :  { %33 = vsyncpa [#allocation4], 0 }
   0xf   :  { %34 = vsyncpa [#allocation8], 0  ;;  %s2841_s7 = sld [smem:[#allocation12_spill]]  ;;  %s2089_s8 = smov [#allocation3]  }
  0x15   :  { %s40_s28 = sshll.u32 %s2841_s7, 4  ;;  %s41_s28 = int_to_ptr.vmem [resolvable:$true] %s40_s28 }
  0x16   :  { %43 = dma.vmem_to_smem %s41_s28, 32, %s2089_s8, [#allocation5]  }
  0x17   :  { %2083 = dma.done.wait [#allocation5], 32  }
  0x18   :  { %2084 = vsyncadd [#allocation5], 4294967264 }
  0x19   :  { %96 = sfence }
  0x1a   :  { %s2842_s0 = sld [smem:[#allocation13_spill]]  ;;  %vm101_vm0 = vcmask 261120   ;;  %v2090_v4 = vmov 32.0   ;;  %vm264_vm8 = vcmask 130048   ;;  %vm327_vm9 = vcmask 64512   ;;  %s2092_s7 = smov [#allocation7]  }
  0x1b   :  { %1961 = vrcp.f32 %v2090_v4  ;;  %s2843_s10 = sld [smem:[#allocation17_spill]]  ;;  %s1761_s8 = sshll.u32 %s2092_s7, 4  ;;  %s1762_s8 = int_to_ptr.vmem [resolvable:$true] %s1761_s8 }
  0x1c   :  { %s2844_s27 = sld [smem:[#allocation19_spill]] }
  0x1d   :  { %s2845_s28 = sld [smem:[#allocation21_spill]] }
  0x1e   :  { %s2846_s9 = sld [smem:[#allocation15_spill]] }
  0x1f   :  { %s2847_s5 = sld [smem:[#allocation16_spill]] }
  0x20   :  { %v97_v0 = vld [vmem:[%s2842_s0] sm:$0xff]  ;;  %v98_v1 = vld [vmem:[%s2842_s0 + $0x8] sm:$0xff]  ;;  %s2848_s3 = sld [smem:[#allocation20_spill]] }
  0x21   :  { %v102_v2 = vsel %vm101_vm0, %v97_v0, 0.0  ;;  %v105_v3 = vsel %vm101_vm0, %v98_v1, 0.0  ;;  %v1962_v5 = vpop.eup %1961  ;;  %v168_v21 = vld [vmem:[%s2843_s10 + $0x18] sm:$0xff]  ;;  %v167_v24 = vld [vmem:[%s2843_s10 + $0x10] sm:$0xff]  ;;  %v166_v27 = vld [vmem:[%s2843_s10 + $0x8] sm:$0xff]  ;;  %s2849_s4 = sld [smem:[#allocation18_spill]] }
  0x22   :  { %103 = vadd.xlane.f32.xlu0 %v102_v2  ;;  %v109_v6 = vmul.f32 32.0, %v1962_v5  ;;  %vm113_vm1 = vweird.f32 %v1962_v5  ;;  %v205_v22 = vld [vmem:[%s2844_s27 + $0x18] sm:$0xff]  ;;  %191 = vmatpush.msra.mxu0 %v168_v21  ;;  %v204_v25 = vld [vmem:[%s2844_s27 + $0x10] sm:$0xff]  ;;  %v203_v28 = vld [vmem:[%s2844_s27 + $0x8] sm:$0xff]  ;;  %s2850_s6 = sld [smem:[#allocation22_spill]] }
  0x23   :  { %v236_v23 = vld [vmem:[%s2845_s28 + $0x18] sm:$0xff]  ;;  %222 = vmatpush.msra.mxu1 %v205_v22  ;;  %v235_v26 = vld [vmem:[%s2845_s28 + $0x10] sm:$0xff]  ;;  %v234_v29 = vld [vmem:[%s2845_s28 + $0x8] sm:$0xff]  ;;  %s2851_s30 = sld [smem:[#allocation14_spill]] }
  0x24   :  { %v110_v7 = vsub.f32 1.0, %v109_v6  ;;  %253 = vmatpush.msra.mxu2 %v236_v23  ;;  %192 = vmatpush.msra.mxu0 %v167_v24  ;;  %v165_v30 = vld [vmem:[%s2843_s10] sm:$0xff]  ;;  %v1799_v36 = vld [vmem:[%s2843_s10 + $0x38] sm:$0xff]  ;;  %v1798_v37 = vld [vmem:[%s2843_s10 + $0x30] sm:$0xff]  ;;  %s1922_s2 = sld [smem:[#allocation3 + $0x81]] }
  0x25   :  { %223 = vmatpush.msra.mxu1 %v204_v25  ;;  %v202_v31 = vld [vmem:[%s2844_s27] sm:$0xff]  ;;  %v1797_v39 = vld [vmem:[%s2843_s10 + $0x28] sm:$0xff]  ;;  %v1806_v6 = vld [vmem:[%s2844_s27 + $0x38] sm:$0xff]  ;;  %s1684_s26 = sld [smem:[#allocation3]] }
  0x26   :  { %v111_v8 = vmul.f32 %v1962_v5, %v110_v7  ;;  %254 = vmatpush.msra.mxu2 %v235_v26  ;;  %193 = vmatpush.msra.mxu0 %v166_v27  ;;  %v233_v32 = vld [vmem:[%s2845_s28] sm:$0xff]  ;;  %s2852_s0 = sld [smem:[#allocation23_spill]] }
  0x27   :  { %224 = vmatpush.msra.mxu1 %v203_v28  ;;  %v1796_v41 = vld [vmem:[%s2843_s10 + $0x20] sm:$0xff] }
  0x28   :  { %v112_v9 = vadd.f32 %v1962_v5, %v111_v8  ;;  %255 = vmatpush.msra.mxu2 %v234_v29  ;;  %194 = vmatpush.msra.mxu0 %v165_v30  ;;  %v1929_v51 = vld [vmem:[%s2846_s9] ss:$0 sm:$0xff]  ;;  %v1805_v8 = vld [vmem:[%s2844_s27 + $0x30] sm:$0xff]  ;;  %v1936_v26 = vld [vmem:[%s2848_s3 + $0x1] ss:$0 sm:$0xff] }
  0x29   :  { %225 = vmatpush.msra.mxu1 %v202_v31  ;;  %v1930_v54 = vld [vmem:[%s2847_s5] ss:$0 sm:$0xff]  ;;  %v2373_v27 = vld [vmem:[%s2851_s30 + $0x1] ss:$0 sm:$0xff]  ;;  %s2091_s5 = smov [#allocation6]  }
  0x2a   :  { %106 = vadd.xlane.f32.xlu0 %v105_v3  ;;  %v2239_v10 = vsel %vm113_vm1, %v1962_v5, %v112_v9  ;;  %256 = vmatpush.msra.mxu2 %v233_v32  ;;  %v1931_v2 = vld [vmem:[%s2849_s4] ss:$0 sm:$0xff]  ;;  %vm813_vm1 = vcmask 523264  }
  0x2b   :  { %420 = vmatpush.msrb.mxu1 %v1799_v36  ;;  %v1933_v9 = vld [vmem:[%s2850_s6] ss:$0 sm:$0xff] }
  0x2c   :  { %v2363_v21 = vld [vmem:[%s2851_s30] ss:$0 sm:$0xff]  ;;  %s1920_s30 = sld [smem:[#allocation3 + $0x80]] }
  0x2d   :  { %421 = vmatpush.msrb.mxu1 %v1798_v37 }
  0x2f   :  { %422 = vmatpush.msrb.mxu1 %v1797_v39 }
  0x31   :  { %423 = vmatpush.msrb.mxu1 %v1796_v41 }
  0x95   :  { %v104_v11 = vpop.xlane.xlu0 %103 }
  0x96   :  { %v115_v12 = vmul.f32 %v2239_v10, %v104_v11  ;;  %v1804_v11 = vld [vmem:[%s2844_s27 + $0x28] sm:$0xff] }
  0x98   :  { %v2242_v13 = vsub.f32 %v97_v0, %v115_v12 }
  0x9a   :  { %v119_v14 = vmul.f32 %v2242_v13, %v2242_v13 }
  0x9c   :  { %v121_v15 = vsel %vm101_vm0, %v119_v14, 0.0  ;;  %v1803_v14 = vld [vmem:[%s2844_s27 + $0x20] sm:$0xff] }
  0x9d   :  { %122 = vadd.xlane.f32.xlu1 %v121_v15  ;;  %v107_v16 = vpop.xlane.xlu0 %106 }
  0x9e   :  { %v116_v17 = vmul.f32 %v2239_v10, %v107_v16 }
  0xa0   :  { %v2248_v18 = vsub.f32 %v98_v1, %v116_v17  ;;  %v1932_v1 = vld [vmem:[%s2848_s3] ss:$0 sm:$0xff] }
  0xa2   :  { %v120_v19 = vmul.f32 %v2248_v18, %v2248_v18 }
  0xa4   :  { %v124_v20 = vsel %vm101_vm0, %v120_v19, 0.0 }
  0xa5   :  { %125 = vadd.xlane.f32.xlu1 %v124_v20 }
 0x110   :  { %v123_v33 = vpop.xlane.xlu1 %122 }
 0x111   :  { %v127_v34 = vmul.f32 %v123_v33, %v2239_v10 }
 0x113   :  { %v129_v35 = vadd.f32 1e-12, %v127_v34 }
 0x115   :  { %1963 = vrsqrt.f32 %v129_v35  ;;  %vm137_vm3 = vweird.f32 %v129_v35 }
 0x118   :  { %v126_v38 = vpop.xlane.xlu1 %125 }
 0x119   :  { %v128_v40 = vmul.f32 %v126_v38, %v2239_v10 }
 0x11b   :  { %v1964_v42 = vpop.eup %1963  ;;  %v130_v43 = vadd.f32 1e-12, %v128_v40 }
 0x11c   :  { %v132_v44 = vmul.f32 %v1964_v42, %v129_v35  ;;  %vm138_vm2 = vweird.f32 %v1964_v42 }
 0x11d   :  { %1965 = vrsqrt.f32 %v130_v43  ;;  %vm139_vm4 = vmor %vm137_vm3, %vm138_vm2  ;;  %vm147_vm6 = vweird.f32 %v130_v43 }
 0x11e   :  { %v133_v45 = vmul.f32 %v1964_v42, %v132_v44  ;;  %v1813_v44 = vld [vmem:[%s2845_s28 + $0x38] sm:$0xff] }
 0x120   :  { %v134_v46 = vmul.f32 0.5, %v133_v45  ;;  %v1812_v45 = vld [vmem:[%s2845_s28 + $0x30] sm:$0xff] }
 0x122   :  { %v135_v47 = vsub.f32 1.5, %v134_v46  ;;  %v1811_v46 = vld [vmem:[%s2845_s28 + $0x28] sm:$0xff] }
 0x123   :  { %v1966_v48 = vpop.eup %1965 }
 0x124   :  { %v136_v49 = vmul.f32 %v1964_v42, %v135_v47  ;;  %v142_v50 = vmul.f32 %v1966_v48, %v130_v43  ;;  %vm148_vm5 = vweird.f32 %v1966_v48  ;;  %v1810_v47 = vld [vmem:[%s2845_s28 + $0x20] sm:$0xff] }
 0x125   :  { %vm149_vm7 = vmor %vm147_vm6, %vm148_vm5 }
 0x126   :  { %v140_v52 = vsel %vm139_vm4, %v1964_v42, %v136_v49  ;;  %v143_v53 = vmul.f32 %v1966_v48, %v142_v50 }
 0x127   :  { %v151_v55 = vmul.f32 %v140_v52, %v2242_v13 }
 0x128   :  { %v144_v56 = vmul.f32 0.5, %v143_v53 }
 0x129   :  { %v156_v57 = vmul.f32 %v1929_v51, %v151_v55 }
 0x12a   :  { %v145_v58 = vsub.f32 1.5, %v144_v56 }
 0x12b   :  { %v2310_v59 = vadd.f32 %v1930_v54, %v156_v57  ;;  %v1934_v57 = vld [vmem:[%s2849_s4 + $0x1] ss:$0 sm:$0xff] }
 0x12c   :  { %v146_v60 = vmul.f32 %v1966_v48, %v145_v58 }
 0x12d   :  { %1784 = vmatmul.msk.f32.vlgmr.msra.gmra.mxu0 %vm101_vm0, %v2310_v59  ;;  %1786 = vmatmul.msk.f32.vlgmr.msra.gmra.mxu1 %vm101_vm0, %v2310_v59 }
 0x12e   :  { %v150_v61 = vsel %vm149_vm7, %v1966_v48, %v146_v60  ;;  %1788 = vmatmul.msk.f32.vlgmr.msra.gmra.mxu2 %vm101_vm0, %v2310_v59  ;;  %v397_v60 = vld [vmem:[%s2805_s11 + $0x8] sm:$0xff] }
 0x12f   :  { %v152_v62 = vmul.f32 %v150_v61, %v2248_v18 }
 0x131   :  { %v157_v63 = vmul.f32 %v1929_v51, %v152_v62 }
 0x133   :  { %v2319_v0 = vadd.f32 %v1930_v54, %v157_v63  ;;  %v396_v63 = vld [vmem:[%s2805_s11] sm:$0xff] }
 0x135   :  { %1785 = vmatmul.msk.f32.gmra.mxu0 %vm101_vm0, %v2319_v0  ;;  %1787 = vmatmul.msk.f32.gmra.mxu1 %vm101_vm0, %v2319_v0 }
 0x136   :  { %1789 = vmatmul.msk.f32.gmra.mxu2 %vm101_vm0, %v2319_v0 }
 0x13d   :  { %1801 = vmatmul.msk.f32.vlgmr.msrb.gmra.mxu1 %vm101_vm0, %v2310_v59 }
 0x145   :  { %1802 = vmatmul.msk.f32.gmra.mxu1 %vm101_vm0, %v2319_v0 }
 0x1aa   :  { %v196_v3 = vpop.f32.mrf.mxu0  ;;  %v227_v4 = vpop.f32.mrf.mxu1 }
 0x1ab   :  { %v228_v5 = vadd.f32 %v1932_v1, %v227_v4  ;;  %v197_v7 = vadd.f32 %v1931_v2, %v196_v3  ;;  %v1938_v3 = vld [vmem:[%s2850_s6 + $0x1] ss:$0 sm:$0xff] }
 0x1ad   :  { %1790 = vmatpush.xpose.msk.msrb.mxu2 %vm264_vm8, %v228_v5 }
 0x1b0   :  { %1791 = vmatmul.msk.f32.vlgmr.msrb.gmra.mxu2 %vm264_vm8, %v197_v7 }
 0x1b1   :  { %453 = vmatpush.msra.mxu2 %v1806_v6  ;;  %v258_v12 = vpop.f32.mrf.mxu2 }
 0x1b2   :  { %v230_v13 = vpop.f32.mrf.mxu1  ;;  %v199_v15 = vpop.f32.mrf.mxu0  ;;  %v259_v17 = vadd.f32 %v1933_v9, %v258_v12 }
 0x1b3   :  { %454 = vmatpush.msra.mxu2 %v1805_v8  ;;  %v231_v16 = vadd.f32 %v1932_v1, %v230_v13  ;;  %v200_v18 = vadd.f32 %v1931_v2, %v199_v15 }
 0x1b5   :  { %455 = vmatpush.msra.mxu2 %v1804_v11  ;;  %1792 = vmatpush.xpose.msk.msra.mxu3 %vm264_vm8, %v231_v16 }
 0x1b7   :  { %456 = vmatpush.msra.mxu2 %v1803_v14 }
 0x1b8   :  { %1793 = vmatmul.msk.f32.vlgmr.msra.gmra.mxu3 %vm264_vm8, %v200_v18  ;;  %1808 = vmatmul.msk.f32.vlgmr.msra.gmra.mxu2 %vm101_vm0, %v2310_v59 }
 0x1b9   :  { %368 = vmatpush.msrb.mxu3 %v259_v17  ;;  %v261_v19 = vpop.f32.mrf.mxu2 }
 0x1ba   :  { %v262_v20 = vadd.f32 %v1933_v9, %v261_v19  ;;  %v425_v56 = vpop.f32.mrf.mxu1 }
 0x1bb   :  { %486 = vmatpush.msra.mxu3 %v1813_v44  ;;  %v426_v58 = vadd.f32 %v1934_v57, %v425_v56 }
 0x1bc   :  { %391 = vmatpush.msrb.mxu0 %v262_v20 }
 0x1bd   :  { %487 = vmatpush.msra.mxu3 %v1812_v45 }
 0x1bf   :  { %488 = vmatpush.msra.mxu3 %v1811_v46 }
 0x1c0   :  { %1809 = vmatmul.msk.f32.gmra.mxu2 %vm101_vm0, %v2319_v0 }
 0x1c1   :  { %489 = vmatpush.msra.mxu3 %v1810_v47 }
 0x1c2   :  { %v428_v61 = vpop.f32.mrf.mxu1 }
 0x1c3   :  { %v429_v62 = vadd.f32 %v1934_v57, %v428_v61 }
 0x233   :  { %v288_v22 = vpop.f32.mrf.mxu2 }
 0x234   :  { %v317_v23 = vmul.f32 0.25, %v288_v22 }
 0x236   :  { %v325_v24 = vadd.f32 %v2363_v21, %v317_v23 }
 0x238   :  { %v328_v25 = vsel %vm327_vm9, %v325_v24, -inf }
 0x239   :  { %329 = vmax.xlane.f32.xlu0 %v328_v25 }
 0x23b   :  { %v314_v28 = vpop.f32.mrf.mxu3  ;;  %v458_v29 = vpop.f32.mrf.mxu2 }
 0x23c   :  { %v318_v30 = vmul.f32 0.25, %v314_v28  ;;  %v459_v31 = vadd.f32 %v1936_v26, %v458_v29  ;;  %v1824_v29 = vld [vmem:[%s2805_s11 + $0x18] sm:$0xff] }
 0x23e   :  { %1817 = vmatpush.xpose.msk.msra.mxu0 %vm264_vm8, %v459_v31  ;;  %v326_v32 = vadd.f32 %v2373_v27, %v318_v30 }
 0x240   :  { %v331_v33 = vsel %vm327_vm9, %v326_v32, -inf }
 0x241   :  { %332 = vmax.xlane.f32.xlu2 %v331_v33 }
 0x243   :  { %v461_v52 = vpop.f32.mrf.mxu2 }
 0x244   :  { %v462_v55 = vadd.f32 %v1936_v26, %v461_v52 }
 0x2ac   :  { %v330_v34 = vpop.xlane.xlu0 %329 }
 0x2ad   :  { %v334_v35 = vsub.f32 %v325_v24, %v330_v34 }
 0x2af   :  { %v336_v36 = vmul.f32 1.442695, %v334_v35 }
 0x2b1   :  { %1967 = vpow2.f32 %v336_v36  ;;  %v1823_v36 = vld [vmem:[%s2805_s11 + $0x10] sm:$0xff] }
 0x2b4   :  { %v333_v37 = vpop.xlane.xlu2 %332 }
 0x2b5   :  { %v335_v38 = vsub.f32 %v326_v32, %v333_v37 }
 0x2b7   :  { %v1968_v39 = vpop.eup %1967  ;;  %v338_v40 = vmul.f32 1.442695, %v335_v38 }
 0x2b8   :  { %v340_v41 = vsel %vm327_vm9, %v1968_v39, 0.0 }
 0x2b9   :  { %1969 = vpow2.f32 %v338_v40  ;;  %341 = vadd.xlane.f32.xlu1 %v340_v41 }
 0x2bf   :  { %v1970_v42 = vpop.eup %1969 }
 0x2c0   :  { %v343_v43 = vsel %vm327_vm9, %v1970_v42, 0.0 }
 0x2c1   :  { %344 = vadd.xlane.f32.xlu2 %v343_v43 }
 0x32c   :  { %v342_v48 = vpop.xlane.xlu1 %341 }
 0x32d   :  { %1971 = vrcp.f32 %v342_v48 }
 0x333   :  { %v1972_v49 = vpop.eup %1971 }
 0x334   :  { %v345_v50 = vpop.xlane.xlu2 %344  ;;  %v348_v51 = vmul.f32 %v1972_v49, %v1968_v39 }
 0x335   :  { %1973 = vrcp.f32 %v345_v50 }
 0x336   :  { %1794 = vmatmul.msk.f32.vlgmr.msrb.gmra.mxu3 %vm327_vm9, %v348_v51 }
 0x337   :  { %644 = vmatpush.msrb.mxu3 %v1824_v29 }
 0x339   :  { %645 = vmatpush.msrb.mxu3 %v1823_v36  ;;  %v805_v36 = vld [vmem:[%s2811_s17 + $0x20] sm:$0xff] }
 0x33b   :  { %v1974_v53 = vpop.eup %1973 }
 0x33c   :  { %v349_v54 = vmul.f32 %v1974_v53, %v1970_v42  ;;  %v1939_v42 = vld [vmem:[%s2806_s12] ss:$0 sm:$0xff] }
 0x33e   :  { %1795 = vmatmul.msk.f32.vlgmr.msrb.gmra.mxu0 %vm327_vm9, %v349_v54  ;;  %1815 = vmatmul.msk.f32.vlgmr.msra.gmra.mxu3 %vm101_vm0, %v2310_v59 }
 0x33f   :  { %1819 = vmatpush.xpose.msk.msrb.mxu0 %vm264_vm8, %v462_v55 }
 0x346   :  { %1816 = vmatmul.msk.f32.gmra.mxu3 %vm101_vm0, %v2319_v0  ;;  %1818 = vmatmul.msk.f32.vlgmr.msra.gmra.mxu0 %vm264_vm8, %v426_v58 }
 0x347   :  { %673 = vmatpush.msra.mxu0 %v397_v60 }
 0x349   :  { %674 = vmatpush.msra.mxu0 %v396_v63  ;;  %v747_v63 = vld [vmem:[%s2809_s15 + $0x8] sm:$0xff] }
 0x34e   :  { %1820 = vmatmul.msk.f32.vlgmr.msrb.gmra.mxu0 %vm264_vm8, %v429_v62  ;;  %v748_v62 = vld [vmem:[%s2809_s15 + $0x10] sm:$0xff] }
 0x3b9   :  { %v370_v1 = vpop.f32.mrf.mxu3 }
 0x3ba   :  { %1827 = vmatmul.msk.f32.vlgmr.msra.gmra.mxu0 %vm264_vm8, %v370_v1  ;;  %v746_v1 = vld [vmem:[%s2809_s15] sm:$0xff] }
 0x3bb   :  { %v393_v2 = vpop.f32.mrf.mxu0 }
 0x3c1   :  { %v491_v4 = vpop.f32.mrf.mxu3 }
 0x3c2   :  { %v492_v5 = vadd.f32 %v1938_v3, %v491_v4  ;;  %1828 = vmatmul.msk.f32.gmra.mxu0 %vm264_vm8, %v393_v2 }
 0x3c3   :  { %v520_v6 = vpop.f32.mrf.mxu0 }
 0x3c4   :  { %v549_v7 = vmul.f32 0.25, %v520_v6  ;;  %593 = vmatpush.msra.mxu1 %v492_v5 }
 0x3c6   :  { %v551_v8 = vadd.f32 %v2363_v21, %v549_v7 }
 0x3c8   :  { %v553_v9 = vsel %vm327_vm9, %v551_v8, -inf }
 0x3c9   :  { %v494_v11 = vpop.f32.mrf.mxu3  ;;  %554 = vmax.xlane.f32.xlu2 %v553_v9 }
 0x3ca   :  { %v495_v12 = vadd.f32 %v1938_v3, %v494_v11 }
 0x3cb   :  { %v546_v13 = vpop.f32.mrf.mxu0 }
 0x3cc   :  { %v550_v14 = vmul.f32 0.25, %v546_v13  ;;  %616 = vmatpush.msrb.mxu2 %v495_v12 }
 0x3ce   :  { %v552_v15 = vadd.f32 %v2373_v27, %v550_v14 }
 0x3d0   :  { %v556_v16 = vsel %vm327_vm9, %v552_v15, -inf }
 0x3d1   :  { %557 = vmax.xlane.f32.xlu0 %v556_v16 }
 0x437   :  { %v676_v39 = vpop.f32.mrf.mxu0 }
 0x43c   :  { %v555_v17 = vpop.xlane.xlu2 %554 }
 0x43d   :  { %v559_v18 = vsub.f32 %v551_v8, %v555_v17 }
 0x43f   :  { %v561_v19 = vmul.f32 1.442695, %v559_v18  ;;  %v679_v46 = vpop.f32.mrf.mxu0  ;;  %v1941_v18 = vld [vmem:[%s2808_s14] ss:$0 sm:$0xff] }
 0x441   :  { %1975 = vpow2.f32 %v561_v19 }
 0x444   :  { %v558_v20 = vpop.xlane.xlu0 %557 }
 0x445   :  { %v560_v22 = vsub.f32 %v552_v15, %v558_v20  ;;  %v1940_v15 = vld [vmem:[%s2807_s13] ss:$0 sm:$0xff] }
 0x447   :  { %v1976_v23 = vpop.eup %1975  ;;  %v563_v24 = vmul.f32 1.442695, %v560_v22 }
 0x448   :  { %v565_v25 = vsel %vm327_vm9, %v1976_v23, 0.0 }
 0x449   :  { %1977 = vpow2.f32 %v563_v24  ;;  %566 = vadd.xlane.f32.xlu1 %v565_v25 }
 0x44f   :  { %v1978_v26 = vpop.eup %1977 }
 0x450   :  { %v568_v28 = vsel %vm327_vm9, %v1978_v26, 0.0 }
 0x451   :  { %569 = vadd.xlane.f32.xlu2 %v568_v28 }
 0x4bc   :  { %v567_v30 = vpop.xlane.xlu1 %566 }
 0x4bd   :  { %1979 = vrcp.f32 %v567_v30 }
 0x4c3   :  { %v1980_v31 = vpop.eup %1979 }
 0x4c4   :  { %v573_v32 = vmul.f32 %v1980_v31, %v1976_v23  ;;  %v570_v33 = vpop.xlane.xlu2 %569 }
 0x4c5   :  { %1981 = vrcp.f32 %v570_v33  ;;  %v808_v33 = vld [vmem:[%s2811_s17 + $0x38] sm:$0xff] }
 0x4c6   :  { %1821 = vmatmul.msk.f32.vlgmr.msra.gmra.mxu1 %vm327_vm9, %v573_v32  ;;  %828 = vmatpush.msra.mxu2 %v808_v33  ;;  %v1847_v33 = vld [vmem:[%s2845_s28 + $0x40] sm:$0xff] }
 0x4cb   :  { %v1982_v34 = vpop.eup %1981 }
 0x4cc   :  { %v574_v35 = vmul.f32 %v1982_v34, %v1978_v26  ;;  %v807_v34 = vld [vmem:[%s2811_s17 + $0x30] sm:$0xff] }
 0x4cd   :  { %829 = vmatpush.msra.mxu2 %v807_v34 }
 0x4ce   :  { %1822 = vmatmul.msk.f32.vlgmr.msrb.gmra.mxu2 %vm327_vm9, %v574_v35  ;;  %v806_v35 = vld [vmem:[%s2811_s17 + $0x28] sm:$0xff] }
 0x4cf   :  { %830 = vmatpush.msra.mxu2 %v806_v35 }
 0x4d1   :  { %831 = vmatpush.msra.mxu2 %v805_v36 }
 0x543   :  { %v595_v37 = vpop.f32.mrf.mxu1 }
 0x544   :  { %1825 = vmatmul.msk.f32.vlgmr.msrb.gmra.mxu3 %vm264_vm8, %v595_v37  ;;  %v804_v37 = vld [vmem:[%s2811_s17 + $0x18] sm:$0xff] }
 0x545   :  { %832 = vmatpush.msra.mxu2 %v804_v37 }
 0x551   :  { %v618_v38 = vpop.f32.mrf.mxu2 }
 0x552   :  { %1826 = vmatmul.msk.f32.gmra.mxu3 %vm264_vm8, %v618_v38  ;;  %v803_v38 = vld [vmem:[%s2811_s17 + $0x10] sm:$0xff] }
 0x553   :  { %833 = vmatpush.msra.mxu2 %v803_v38 }
 0x5c7   :  { %v647_v40 = vpop.f32.mrf.mxu3 }
 0x5c8   :  { %v677_v41 = vadd.f32 %v676_v39, %v647_v40  ;;  %v802_v39 = vld [vmem:[%s2811_s17 + $0x8] sm:$0xff]  ;;  %v801_v40 = vld [vmem:[%s2811_s17] sm:$0xff] }
 0x5c9   :  { %834 = vmatpush.msra.mxu2 %v802_v39 }
 0x5ca   :  { %v682_v43 = vadd.f32 %v677_v41, %v2310_v59  ;;  %v1942_v41 = vld [vmem:[%s2810_s16] ss:$0 sm:$0xff] }
 0x5cb   :  { %835 = vmatpush.msra.mxu2 %v801_v40 }
 0x5cc   :  { %v688_v44 = vadd.f32 %v1939_v42, %v682_v43 }
 0x5ce   :  { %v692_v45 = vsel %vm101_vm0, %v688_v44, 0.0 }
 0x5cf   :  { %693 = vadd.xlane.f32.xlu0 %v692_v45 }
 0x5d5   :  { %v650_v47 = vpop.f32.mrf.mxu3 }
 0x5d6   :  { %v680_v48 = vadd.f32 %v679_v46, %v650_v47 }
 0x5d8   :  { %v683_v49 = vadd.f32 %v680_v48, %v2319_v0  ;;  %v749_v0 = vld [vmem:[%s2809_s15 + $0x18] sm:$0xff] }
 0x5d9   :  { %772 = vmatpush.msrb.mxu1 %v749_v0 }
 0x5da   :  { %v689_v50 = vadd.f32 %v1939_v42, %v683_v49 }
 0x5db   :  { %773 = vmatpush.msrb.mxu1 %v748_v62 }
 0x5dc   :  { %v695_v51 = vsel %vm101_vm0, %v689_v50, 0.0 }
 0x5dd   :  { %696 = vadd.xlane.f32.xlu1 %v695_v51  ;;  %774 = vmatpush.msrb.mxu1 %v747_v63  ;;  %v1943_v63 = vld [vmem:[%s2812_s18] ss:$0 sm:$0xff] }
 0x5df   :  { %775 = vmatpush.msrb.mxu1 %v746_v1 }
 0x642   :  { %v694_v52 = vpop.xlane.xlu0 %693 }
 0x643   :  { %v698_v53 = vmul.f32 %v694_v52, %v2239_v10 }
 0x645   :  { %v700_v54 = vsub.f32 %v688_v44, %v698_v53 }
 0x647   :  { %v702_v55 = vmul.f32 %v700_v54, %v700_v54 }
 0x649   :  { %v704_v59 = vsel %vm101_vm0, %v702_v55, 0.0 }
 0x64a   :  { %705 = vadd.xlane.f32.xlu2 %v704_v59 }
 0x650   :  { %v697_v56 = vpop.xlane.xlu1 %696 }
 0x651   :  { %v699_v57 = vmul.f32 %v697_v56, %v2239_v10 }
 0x653   :  { %v701_v58 = vsub.f32 %v689_v50, %v699_v57 }
 0x655   :  { %v703_v60 = vmul.f32 %v701_v58, %v701_v58 }
 0x657   :  { %v707_v61 = vsel %vm101_vm0, %v703_v60, 0.0 }
 0x658   :  { %708 = vadd.xlane.f32.xlu0 %v707_v61 }
 0x6bd   :  { %v706_v2 = vpop.xlane.xlu2 %705 }
 0x6be   :  { %v710_v3 = vmul.f32 %v706_v2, %v2239_v10 }
 0x6c0   :  { %v712_v4 = vadd.f32 1e-12, %v710_v3 }
 0x6c2   :  { %1983 = vrsqrt.f32 %v712_v4  ;;  %vm720_vm11 = vweird.f32 %v712_v4 }
 0x6c8   :  { %v1984_v5 = vpop.eup %1983 }
 0x6c9   :  { %v715_v6 = vmul.f32 %v1984_v5, %v712_v4  ;;  %vm721_vm10 = vweird.f32 %v1984_v5 }
 0x6ca   :  { %vm722_vm12 = vmor %vm720_vm11, %vm721_vm10 }
 0x6cb   :  { %v716_v7 = vmul.f32 %v1984_v5, %v715_v6  ;;  %v709_v8 = vpop.xlane.xlu0 %708 }
 0x6cc   :  { %v711_v9 = vmul.f32 %v709_v8, %v2239_v10 }
 0x6cd   :  { %v717_v11 = vmul.f32 0.5, %v716_v7 }
 0x6ce   :  { %v713_v12 = vadd.f32 1e-12, %v711_v9 }
 0x6cf   :  { %v718_v13 = vsub.f32 1.5, %v717_v11 }
 0x6d0   :  { %1985 = vrsqrt.f32 %v713_v12  ;;  %vm730_vm14 = vweird.f32 %v713_v12 }
 0x6d1   :  { %v719_v14 = vmul.f32 %v1984_v5, %v718_v13 }
 0x6d3   :  { %v723_v16 = vsel %vm722_vm12, %v1984_v5, %v719_v14 }
 0x6d4   :  { %v734_v17 = vmul.f32 %v723_v16, %v700_v54 }
 0x6d6   :  { %v1986_v19 = vpop.eup %1985  ;;  %v739_v20 = vmul.f32 %v1940_v15, %v734_v17 }
 0x6d7   :  { %v725_v22 = vmul.f32 %v1986_v19, %v713_v12  ;;  %vm731_vm13 = vweird.f32 %v1986_v19 }
 0x6d8   :  { %v744_v23 = vadd.f32 %v1941_v18, %v739_v20  ;;  %vm732_vm15 = vmor %vm730_vm14, %vm731_vm13  ;;  %v1836_v20 = vld [vmem:[%s2843_s10 + $0x58] sm:$0xff] }
 0x6d9   :  { %v726_v24 = vmul.f32 %v1986_v19, %v725_v22  ;;  %v1843_v22 = vld [vmem:[%s2844_s27 + $0x58] sm:$0xff]  ;;  %929 = vmatpush.msra.mxu3 %v1836_v20 }
 0x6da   :  { %1829 = vmatmul.msk.f32.vlgmr.msrb.gmra.mxu1 %vm101_vm0, %v744_v23  ;;  %962 = vmatpush.msrb.mxu0 %v1843_v22  ;;  %v1869_v22 = vld [vmem:[%s2844_s27 + $0x60] sm:$0xff] }
 0x6db   :  { %v727_v25 = vmul.f32 0.5, %v726_v24  ;;  %v1835_v24 = vld [vmem:[%s2843_s10 + $0x50] sm:$0xff] }
 0x6dc   :  { %930 = vmatpush.msra.mxu3 %v1835_v24 }
 0x6dd   :  { %v728_v26 = vsub.f32 1.5, %v727_v25  ;;  %v1842_v25 = vld [vmem:[%s2844_s27 + $0x50] sm:$0xff] }
 0x6de   :  { %963 = vmatpush.msrb.mxu0 %v1842_v25 }
 0x6df   :  { %v729_v28 = vmul.f32 %v1986_v19, %v728_v26  ;;  %v1849_v26 = vld [vmem:[%s2845_s28 + $0x50] sm:$0xff] }
 0x6e1   :  { %v733_v29 = vsel %vm732_vm15, %v1986_v19, %v729_v28  ;;  %v1834_v28 = vld [vmem:[%s2843_s10 + $0x48] sm:$0xff] }
 0x6e2   :  { %v735_v30 = vmul.f32 %v733_v29, %v701_v58  ;;  %v1841_v29 = vld [vmem:[%s2844_s27 + $0x48] sm:$0xff]  ;;  %931 = vmatpush.msra.mxu3 %v1834_v28 }
 0x6e3   :  { %964 = vmatpush.msrb.mxu0 %v1841_v29 }
 0x6e4   :  { %v740_v31 = vmul.f32 %v1940_v15, %v735_v30  ;;  %v1848_v30 = vld [vmem:[%s2845_s28 + $0x48] sm:$0xff] }
 0x6e6   :  { %v745_v32 = vadd.f32 %v1941_v18, %v740_v31  ;;  %v1833_v31 = vld [vmem:[%s2843_s10 + $0x40] sm:$0xff] }
 0x6e7   :  { %932 = vmatpush.msra.mxu3 %v1833_v31 }
 0x6e8   :  { %1830 = vmatmul.msk.f32.gmra.mxu1 %vm101_vm0, %v745_v32 }
 0x757   :  { %v777_v42 = vpop.f32.mrf.mxu1 }
 0x758   :  { %v778_v43 = vadd.f32 %v1942_v41, %v777_v42 }
 0x75a   :  { %v785_v44 = vmul.f32 0.044715, %v778_v43  ;;  %v783_v54 = vmul.f32 0.5, %v778_v43 }
 0x75c   :  { %v787_v45 = vmul.f32 %v785_v44, %v778_v43 }
 0x75e   :  { %v789_v46 = vmul.f32 %v787_v45, %v778_v43 }
 0x760   :  { %v791_v47 = vadd.f32 %v789_v46, %v778_v43  ;;  %v1944_v46 = vld [vmem:[%s2813_s19] ss:$0 sm:$0xff] }
 0x762   :  { %v793_v48 = vmul.f32 0.7978846, %v791_v47 }
 0x764   :  { %1987 = vtanh.f32 %v793_v48  ;;  %v1945_v48 = vld [vmem:[%s2814_s20] ss:$0 sm:$0xff] }
 0x765   :  { %v780_v49 = vpop.f32.mrf.mxu1 }
 0x766   :  { %v781_v50 = vadd.f32 %v1942_v41, %v780_v49 }
 0x768   :  { %v786_v51 = vmul.f32 0.044715, %v781_v50  ;;  %v784_v61 = vmul.f32 0.5, %v781_v50 }
 0x76a   :  { %v1988_v52 = vpop.eup %1987  ;;  %v788_v53 = vmul.f32 %v786_v51, %v781_v50 }
 0x76b   :  { %v797_v55 = vadd.f32 1.0, %v1988_v52 }
 0x76c   :  { %v790_v59 = vmul.f32 %v788_v53, %v781_v50 }
 0x76d   :  { %v799_v56 = vmul.f32 %v797_v55, %v783_v54 }
 0x76e   :  { %v792_v57 = vadd.f32 %v790_v59, %v781_v50 }
 0x76f   :  { %1831 = vmatmul.msk.f32.vlgmr.msra.gmra.mxu2 %vm813_vm1, %v799_v56 }
 0x770   :  { %v794_v58 = vmul.f32 0.7978846, %v792_v57 }
 0x772   :  { %1989 = vtanh.f32 %v794_v58 }
 0x778   :  { %v1990_v60 = vpop.eup %1989 }
 0x779   :  { %v798_v0 = vadd.f32 1.0, %v1990_v60 }
 0x77b   :  { %v800_v62 = vmul.f32 %v798_v0, %v784_v61  ;;  %v1946_v0 = vld [vmem:[%s2848_s3 + $0x2] ss:$0 sm:$0xff] }
 0x77d   :  { %1832 = vmatmul.msk.f32.gmra.mxu2 %vm813_vm1, %v800_v62  ;;  %v1947_v62 = vld [vmem:[%s2850_s6 + $0x2] ss:$0 sm:$0xff] }
 0x7f2   :  { %v837_v1 = vpop.f32.mrf.mxu2 }
 0x7f3   :  { %v838_v2 = vadd.f32 %v1943_v63, %v837_v1 }
 0x7f5   :  { %v843_v3 = vadd.f32 %v838_v2, %v744_v23  ;;  %v1850_v23 = vld [vmem:[%s2845_s28 + $0x58] sm:$0xff] }
 0x7f6   :  { %995 = vmatpush.msra.mxu1 %v1850_v23 }
 0x7f7   :  { %v847_v4 = vsel %vm101_vm0, %v843_v3, 0.0 }
 0x7f8   :  { %848 = vadd.xlane.f32.xlu1 %v847_v4  ;;  %996 = vmatpush.msra.mxu1 %v1849_v26 }
 0x7fa   :  { %997 = vmatpush.msra.mxu1 %v1848_v30 }
 0x7fc   :  { %998 = vmatpush.msra.mxu1 %v1847_v33 }
 0x800   :  { %v840_v5 = vpop.f32.mrf.mxu2 }
 0x801   :  { %v841_v6 = vadd.f32 %v1943_v63, %v840_v5  ;;  %v1948_v5 = vld [vmem:[%s2849_s4 + $0x2] ss:$0 sm:$0xff] }
 0x803   :  { %v844_v7 = vadd.f32 %v841_v6, %v745_v32  ;;  %v1840_v32 = vld [vmem:[%s2844_s27 + $0x40] sm:$0xff]  ;;  %v1864_v6 = vld [vmem:[%s2843_s10 + $0x70] sm:$0xff] }
 0x804   :  { %965 = vmatpush.msrb.mxu0 %v1840_v32  ;;  %v1950_v32 = vld [vmem:[%s2848_s3 + $0x3] ss:$0 sm:$0xff] }
 0x805   :  { %v850_v8 = vsel %vm101_vm0, %v844_v7, 0.0 }
 0x806   :  { %851 = vadd.xlane.f32.xlu2 %v850_v8 }
 0x86b   :  { %v849_v9 = vpop.xlane.xlu1 %848 }
 0x86c   :  { %v853_v11 = vmul.f32 %v849_v9, %v2239_v10 }
 0x86e   :  { %v855_v12 = vsub.f32 %v843_v3, %v853_v11  ;;  %v1865_v3 = vld [vmem:[%s2843_s10 + $0x78] sm:$0xff]  ;;  %v1862_v11 = vld [vmem:[%s2843_s10 + $0x60] sm:$0xff] }
 0x870   :  { %v857_v13 = vmul.f32 %v855_v12, %v855_v12 }
 0x872   :  { %v859_v14 = vsel %vm101_vm0, %v857_v13, 0.0 }
 0x873   :  { %860 = vadd.xlane.f32.xlu0 %v859_v14 }
 0x879   :  { %v852_v15 = vpop.xlane.xlu2 %851 }
 0x87a   :  { %v854_v16 = vmul.f32 %v852_v15, %v2239_v10  ;;  %v1872_v15 = vld [vmem:[%s2844_s27 + $0x78] sm:$0xff] }
 0x87c   :  { %v2501_v17 = vsub.f32 %v844_v7, %v854_v16  ;;  %v1863_v7 = vld [vmem:[%s2843_s10 + $0x68] sm:$0xff] }
 0x87e   :  { %v858_v18 = vmul.f32 %v2501_v17, %v2501_v17 }
 0x880   :  { %v862_v19 = vsel %vm101_vm0, %v858_v18, 0.0  ;;  %v1870_v18 = vld [vmem:[%s2844_s27 + $0x68] sm:$0xff] }
 0x881   :  { %863 = vadd.xlane.f32.xlu1 %v862_v19 }
 0x8e6   :  { %v861_v34 = vpop.xlane.xlu0 %860 }
 0x8e7   :  { %v865_v35 = vmul.f32 %v861_v34, %v2239_v10 }
 0x8e9   :  { %v867_v36 = vadd.f32 1e-12, %v865_v35 }
 0x8eb   :  { %1991 = vrsqrt.f32 %v867_v36  ;;  %vm875_vm3 = vweird.f32 %v867_v36 }
 0x8f1   :  { %v1992_v37 = vpop.eup %1991 }
 0x8f2   :  { %v870_v38 = vmul.f32 %v1992_v37, %v867_v36  ;;  %vm876_vm2 = vweird.f32 %v1992_v37 }
 0x8f3   :  { %vm877_vm4 = vmor %vm875_vm3, %vm876_vm2 }
 0x8f4   :  { %v871_v39 = vmul.f32 %v1992_v37, %v870_v38  ;;  %v864_v40 = vpop.xlane.xlu1 %863 }
 0x8f5   :  { %v866_v41 = vmul.f32 %v864_v40, %v2239_v10 }
 0x8f6   :  { %v872_v42 = vmul.f32 0.5, %v871_v39 }
 0x8f7   :  { %v868_v43 = vadd.f32 1e-12, %v866_v41 }
 0x8f8   :  { %v873_v44 = vsub.f32 1.5, %v872_v42 }
 0x8f9   :  { %1993 = vrsqrt.f32 %v868_v43  ;;  %vm885_vm6 = vweird.f32 %v868_v43 }
 0x8fa   :  { %v874_v45 = vmul.f32 %v1992_v37, %v873_v44 }
 0x8fc   :  { %v878_v47 = vsel %vm877_vm4, %v1992_v37, %v874_v45  ;;  %v1879_v45 = vld [vmem:[%s2845_s28 + $0x78] sm:$0xff] }
 0x8fd   :  { %v889_v49 = vmul.f32 %v878_v47, %v855_v12  ;;  %v1877_v47 = vld [vmem:[%s2845_s28 + $0x68] sm:$0xff] }
 0x8ff   :  { %v1994_v50 = vpop.eup %1993  ;;  %v894_v51 = vmul.f32 %v1944_v46, %v889_v49 }
 0x900   :  { %v880_v52 = vmul.f32 %v1994_v50, %v868_v43  ;;  %vm886_vm5 = vweird.f32 %v1994_v50 }
 0x901   :  { %v2550_v53 = vadd.f32 %v1945_v48, %v894_v51  ;;  %vm887_vm7 = vmor %vm885_vm6, %vm886_vm5  ;;  %vm1649_vm5 = vcmask 1040384   ;;  %vm1708_vm6 = vcmask 1041408  }
 0x902   :  { %v881_v54 = vmul.f32 %v1994_v50, %v880_v52 }
 0x903   :  { %1838 = vmatmul.msk.f32.vlgmr.msra.gmra.mxu3 %vm101_vm0, %v2550_v53  ;;  %1845 = vmatmul.msk.f32.vlgmr.msrb.gmra.mxu0 %vm101_vm0, %v2550_v53 }
 0x904   :  { %v882_v55 = vmul.f32 0.5, %v881_v54  ;;  %1852 = vmatmul.msk.f32.vlgmr.msra.gmra.mxu1 %vm101_vm0, %v2550_v53 }
 0x906   :  { %v883_v59 = vsub.f32 1.5, %v882_v55 }
 0x908   :  { %v884_v56 = vmul.f32 %v1994_v50, %v883_v59 }
 0x90a   :  { %v888_v57 = vsel %vm887_vm7, %v1994_v50, %v884_v56  ;;  %vm1710_vm7 = vcmask 1042432  }
 0x90b   :  { %v890_v58 = vmul.f32 %v888_v57, %v2501_v17  ;;  %v1871_v17 = vld [vmem:[%s2844_s27 + $0x70] sm:$0xff] }
 0x90d   :  { %v895_v60 = vmul.f32 %v1944_v46, %v890_v58  ;;  %v1878_v46 = vld [vmem:[%s2845_s28 + $0x70] sm:$0xff]  ;;  %v1949_v58 = vld [vmem:[%s2849_s4 + $0x3] ss:$0 sm:$0xff]  ;;  %s1750_s4 = sshll.u32 %s2091_s5, 4  ;;  %s1751_s4 = int_to_ptr.vmem [resolvable:$true] %s1750_s4 }
 0x90f   :  { %v2559_v61 = vadd.f32 %v1945_v48, %v895_v60  ;;  %v1876_v48 = vld [vmem:[%s2845_s28 + $0x60] sm:$0xff] }
 0x911   :  { %1839 = vmatmul.msk.f32.gmra.mxu3 %vm101_vm0, %v2559_v61  ;;  %1846 = vmatmul.msk.f32.gmra.mxu0 %vm101_vm0, %v2559_v61 }
 0x912   :  { %1853 = vmatmul.msk.f32.gmra.mxu1 %vm101_vm0, %v2559_v61 }
 0x980   :  { %v967_v63 = vpop.f32.mrf.mxu0 }
 0x981   :  { %v968_v1 = vadd.f32 %v1946_v0, %v967_v63  ;;  %v1000_v2 = vpop.f32.mrf.mxu1 }
 0x982   :  { %v1001_v4 = vadd.f32 %v1947_v62, %v1000_v2 }
 0x983   :  { %1854 = vmatpush.xpose.msk.msrb.mxu2 %vm264_vm8, %v968_v1  ;;  %v1860_v1 = vld [vmem:[%s2805_s11 + $0x20] sm:$0xff] }
 0x984   :  { %1102 = vmatpush.msra.mxu0 %v1001_v4 }
 0x986   :  { %v934_v8 = vpop.f32.mrf.mxu3  ;;  %1221 = vmatpush.msrb.mxu0 %v1879_v45 }
 0x987   :  { %1155 = vmatpush.msra.mxu2 %v1865_v3  ;;  %v935_v9 = vadd.f32 %v1948_v5, %v934_v8  ;;  %v1951_v3 = vld [vmem:[%s2850_s6 + $0x3] ss:$0 sm:$0xff] }
 0x988   :  { %1222 = vmatpush.msrb.mxu0 %v1878_v46 }
 0x989   :  { %1156 = vmatpush.msra.mxu2 %v1864_v6 }
 0x98a   :  { %1855 = vmatmul.msk.f32.vlgmr.msrb.gmra.mxu2 %vm264_vm8, %v935_v9  ;;  %1223 = vmatpush.msrb.mxu0 %v1877_v47 }
 0x98b   :  { %1157 = vmatpush.msra.mxu2 %v1863_v7 }
 0x98c   :  { %1224 = vmatpush.msrb.mxu0 %v1876_v48 }
 0x98d   :  { %1158 = vmatpush.msra.mxu2 %v1862_v11 }
 0x98e   :  { %v970_v12 = vpop.f32.mrf.mxu0 }
 0x98f   :  { %v971_v13 = vadd.f32 %v1946_v0, %v970_v12  ;;  %v1003_v14 = vpop.f32.mrf.mxu1  ;;  %v1861_v0 = vld [vmem:[%s2805_s11 + $0x28] sm:$0xff] }
 0x990   :  { %v1004_v16 = vadd.f32 %v1947_v62, %v1003_v14 }
 0x991   :  { %1856 = vmatpush.xpose.msk.msrb.mxu3 %vm264_vm8, %v971_v13 }
 0x992   :  { %1867 = vmatmul.msk.f32.vlgmr.msra.gmra.mxu2 %vm101_vm0, %v2550_v53  ;;  %1125 = vmatpush.msrb.mxu1 %v1004_v16 }
 0x994   :  { %v937_v19 = vpop.f32.mrf.mxu3 }
 0x995   :  { %1188 = vmatpush.msra.mxu3 %v1872_v15  ;;  %v938_v20 = vadd.f32 %v1948_v5, %v937_v19 }
 0x997   :  { %1189 = vmatpush.msra.mxu3 %v1871_v17 }
 0x998   :  { %1857 = vmatmul.msk.f32.vlgmr.msrb.gmra.mxu3 %vm264_vm8, %v938_v20 }
 0x999   :  { %1190 = vmatpush.msra.mxu3 %v1870_v18 }
 0x99a   :  { %1868 = vmatmul.msk.f32.gmra.mxu2 %vm101_vm0, %v2559_v61 }
 0x99b   :  { %1191 = vmatpush.msra.mxu3 %v1869_v22 }
 0x9a0   :  { %1874 = vmatmul.msk.f32.vlgmr.msra.gmra.mxu3 %vm101_vm0, %v2550_v53 }
 0x9a8   :  { %1875 = vmatmul.msk.f32.gmra.mxu3 %vm101_vm0, %v2559_v61 }
 0xa0d   :  { %v1029_v23 = vpop.f32.mrf.mxu2 }
 0xa0e   :  { %v1058_v24 = vmul.f32 0.25, %v1029_v23 }
 0xa10   :  { %v1060_v25 = vadd.f32 %v2363_v21, %v1058_v24 }
 0xa12   :  { %v1062_v26 = vsel %vm327_vm9, %v1060_v25, -inf }
 0xa13   :  { %1063 = vmax.xlane.f32.xlu1 %v1062_v26 }
 0xa15   :  { %v1160_v57 = vpop.f32.mrf.mxu2 }
 0xa16   :  { %v1161_v60 = vadd.f32 %v1949_v58, %v1160_v57 }
 0xa1b   :  { %v1055_v28 = vpop.f32.mrf.mxu3 }
 0xa1c   :  { %v1059_v29 = vmul.f32 0.25, %v1055_v28 }
 0xa1d   :  { %v1163_v62 = vpop.f32.mrf.mxu2 }
 0xa1e   :  { %v1061_v30 = vadd.f32 %v2373_v27, %v1059_v29  ;;  %v1164_v63 = vadd.f32 %v1949_v58, %v1163_v62  ;;  %v1899_v62 = vld [vmem:[%s2809_s15 + $0x28] sm:$0xff] }
 0xa20   :  { %v1065_v31 = vsel %vm327_vm9, %v1061_v30, -inf }
 0xa21   :  { %1066 = vmax.xlane.f32.xlu2 %v1065_v31 }
 0xa23   :  { %v1193_v33 = vpop.f32.mrf.mxu3 }
 0xa24   :  { %v1194_v34 = vadd.f32 %v1950_v32, %v1193_v33 }
 0xa26   :  { %1883 = vmatpush.xpose.msk.msra.mxu1 %vm264_vm8, %v1194_v34 }
 0xa2b   :  { %v1196_v54 = vpop.f32.mrf.mxu3 }
 0xa2c   :  { %v1197_v56 = vadd.f32 %v1950_v32, %v1196_v54 }
 0xa86   :  { %v1064_v35 = vpop.xlane.xlu1 %1063 }
 0xa87   :  { %v1068_v36 = vsub.f32 %v1060_v25, %v1064_v35  ;;  %v1889_v35 = vld [vmem:[%s2805_s11 + $0x30] sm:$0xff] }
 0xa89   :  { %v1070_v37 = vmul.f32 1.442695, %v1068_v36 }
 0xa8b   :  { %1995 = vpow2.f32 %v1070_v37 }
 0xa91   :  { %v1996_v38 = vpop.eup %1995 }
 0xa92   :  { %v1074_v39 = vsel %vm327_vm9, %v1996_v38, 0.0 }
 0xa93   :  { %1075 = vadd.xlane.f32.xlu2 %v1074_v39 }
 0xa94   :  { %v1067_v40 = vpop.xlane.xlu2 %1066 }
 0xa95   :  { %v1069_v41 = vsub.f32 %v1061_v30, %v1067_v40 }
 0xa97   :  { %v1072_v42 = vmul.f32 1.442695, %v1069_v41  ;;  %v1952_v41 = vld [vmem:[%s2806_s12 + $0x1] ss:$0 sm:$0xff] }
 0xa99   :  { %1997 = vpow2.f32 %v1072_v42 }
 0xa9f   :  { %v1998_v43 = vpop.eup %1997 }
 0xaa0   :  { %v1077_v44 = vsel %vm327_vm9, %v1998_v43, 0.0 }
 0xaa1   :  { %1078 = vadd.xlane.f32.xlu0 %v1077_v44 }
 0xb06   :  { %v1076_v49 = vpop.xlane.xlu2 %1075 }
 0xb07   :  { %1999 = vrcp.f32 %v1076_v49 }
 0xb0d   :  { %v2000_v50 = vpop.eup %1999 }
 0xb0e   :  { %v1082_v51 = vmul.f32 %v2000_v50, %v1996_v38 }
 0xb10   :  { %1858 = vmatmul.msk.f32.vlgmr.msra.gmra.mxu0 %vm327_vm9, %v1082_v51 }
 0xb14   :  { %v1079_v52 = vpop.xlane.xlu0 %1078 }
 0xb15   :  { %2001 = vrcp.f32 %v1079_v52 }
 0xb18   :  { %1881 = vmatmul.msk.f32.vlgmr.msrb.gmra.mxu0 %vm101_vm0, %v2550_v53 }
 0xb1b   :  { %v2002_v55 = vpop.eup %2001 }
 0xb1c   :  { %v1083_v59 = vmul.f32 %v2002_v55, %v1998_v43 }
 0xb1e   :  { %1859 = vmatmul.msk.f32.vlgmr.msrb.gmra.mxu1 %vm327_vm9, %v1083_v59 }
 0xb1f   :  { %1885 = vmatpush.xpose.msk.msrb.mxu1 %vm264_vm8, %v1197_v56 }
 0xb20   :  { %1882 = vmatmul.msk.f32.gmra.mxu0 %vm101_vm0, %v2559_v61 }
 0xb26   :  { %1884 = vmatmul.msk.f32.vlgmr.msra.gmra.mxu1 %vm264_vm8, %v1161_v60 }
 0xb27   :  { %1408 = vmatpush.msra.mxu1 %v1861_v0  ;;  %v1900_v0 = vld [vmem:[%s2809_s15 + $0x30] sm:$0xff] }
 0xb29   :  { %1409 = vmatpush.msra.mxu1 %v1860_v1 }
 0xb2e   :  { %1886 = vmatmul.msk.f32.vlgmr.msrb.gmra.mxu1 %vm264_vm8, %v1164_v63  ;;  %v1898_v63 = vld [vmem:[%s2809_s15 + $0x20] sm:$0xff] }
 0xb8d   :  { %v1104_v2 = vpop.f32.mrf.mxu0 }
 0xb8e   :  { %1893 = vmatmul.msk.f32.vlgmr.msra.gmra.mxu1 %vm264_vm8, %v1104_v2 }
 0xb95   :  { %v1226_v4 = vpop.f32.mrf.mxu0 }
 0xb96   :  { %v1227_v5 = vadd.f32 %v1951_v3, %v1226_v4 }
 0xb98   :  { %1328 = vmatpush.msrb.mxu2 %v1227_v5 }
 0xb9b   :  { %v1127_v6 = vpop.f32.mrf.mxu1 }
 0xb9c   :  { %1894 = vmatmul.msk.f32.gmra.mxu1 %vm264_vm8, %v1127_v6 }
 0xb9d   :  { %v1229_v7 = vpop.f32.mrf.mxu0 }
 0xb9e   :  { %v1230_v8 = vadd.f32 %v1951_v3, %v1229_v7 }
 0xba0   :  { %1351 = vmatpush.msrb.mxu3 %v1230_v8 }
 0xba3   :  { %v1255_v9 = vpop.f32.mrf.mxu1 }
 0xba4   :  { %v1284_v11 = vmul.f32 0.25, %v1255_v9 }
 0xba6   :  { %v1286_v12 = vadd.f32 %v2363_v21, %v1284_v11 }
 0xba8   :  { %v1288_v13 = vsel %vm327_vm9, %v1286_v12, -inf }
 0xba9   :  { %1289 = vmax.xlane.f32.xlu0 %v1288_v13 }
 0xbab   :  { %v1281_v14 = vpop.f32.mrf.mxu1 }
 0xbac   :  { %v1285_v15 = vmul.f32 0.25, %v1281_v14 }
 0xbae   :  { %v1287_v16 = vadd.f32 %v2373_v27, %v1285_v15  ;;  %v1890_v27 = vld [vmem:[%s2805_s11 + $0x38] sm:$0xff]  ;;  %s1763_s11 = sshll.u32 %s2852_s0, 4  ;;  %s1764_s11 = int_to_ptr.hbm [resolvable:$true] %s1763_s11 }
 0xbaf   :  { %1379 = vmatpush.msra.mxu0 %v1890_v27 }
 0xbb0   :  { %v1291_v17 = vsel %vm327_vm9, %v1287_v16, -inf }
 0xbb1   :  { %1292 = vmax.xlane.f32.xlu1 %v1291_v17  ;;  %1380 = vmatpush.msra.mxu0 %v1889_v35  ;;  %v1907_v35 = vld [vmem:[%s2811_s17 + $0x50] sm:$0xff] }
 0xc0b   :  { %v1411_v38 = vpop.f32.mrf.mxu1 }
 0xc19   :  { %v1414_v45 = vpop.f32.mrf.mxu1 }
 0xc1c   :  { %v1290_v18 = vpop.xlane.xlu0 %1289 }
 0xc1d   :  { %v1294_v19 = vsub.f32 %v1286_v12, %v1290_v18 }
 0xc1f   :  { %v1296_v20 = vmul.f32 1.442695, %v1294_v19 }
 0xc21   :  { %2003 = vpow2.f32 %v1296_v20  ;;  %v1954_v20 = vld [vmem:[%s2808_s14 + $0x1] ss:$0 sm:$0xff]  ;;  %s1752_s14 = sshll.u32 %s2819_s25, 4  ;;  %s1753_s14 = int_to_ptr.hbm [resolvable:$true] %s1752_s14 }
 0xc24   :  { %v1293_v22 = vpop.xlane.xlu1 %1292 }
 0xc25   :  { %v1295_v23 = vsub.f32 %v1287_v16, %v1293_v22  ;;  %v1953_v16 = vld [vmem:[%s2807_s13 + $0x1] ss:$0 sm:$0xff] }
 0xc27   :  { %v2004_v24 = vpop.eup %2003  ;;  %v1298_v25 = vmul.f32 1.442695, %v1295_v23 }
 0xc28   :  { %v1300_v21 = vsel %vm327_vm9, %v2004_v24, 0.0 }
 0xc29   :  { %2005 = vpow2.f32 %v1298_v25  ;;  %1301 = vadd.xlane.f32.xlu2 %v1300_v21 }
 0xc2f   :  { %v2006_v26 = vpop.eup %2005 }
 0xc30   :  { %v1303_v28 = vsel %vm327_vm9, %v2006_v26, 0.0 }
 0xc31   :  { %1304 = vadd.xlane.f32.xlu0 %v1303_v28 }
 0xc9c   :  { %v1302_v29 = vpop.xlane.xlu2 %1301 }
 0xc9d   :  { %2007 = vrcp.f32 %v1302_v29 }
 0xca3   :  { %v2008_v30 = vpop.eup %2007 }
 0xca4   :  { %v1308_v31 = vmul.f32 %v2008_v30, %v2004_v24  ;;  %v1305_v32 = vpop.xlane.xlu0 %1304  ;;  %v1912_v30 = vld [vmem:[%s2811_s17 + $0x78] sm:$0xff] }
 0xca5   :  { %2009 = vrcp.f32 %v1305_v32  ;;  %1569 = vmatpush.msra.mxu3 %v1912_v30  ;;  %v1910_v32 = vld [vmem:[%s2811_s17 + $0x68] sm:$0xff] }
 0xca6   :  { %1887 = vmatmul.msk.f32.vlgmr.msrb.gmra.mxu2 %vm327_vm9, %v1308_v31  ;;  %v1911_v31 = vld [vmem:[%s2811_s17 + $0x70] sm:$0xff] }
 0xca7   :  { %1570 = vmatpush.msra.mxu3 %v1911_v31 }
 0xca9   :  { %1571 = vmatpush.msra.mxu3 %v1910_v32  ;;  %v1712_v32 = vld [vmem:[%s2817_s23] sm:$0xff] }
 0xcab   :  { %v2010_v33 = vpop.eup %2009 }
 0xcac   :  { %v1309_v34 = vmul.f32 %v2010_v33, %v2006_v26  ;;  %v1909_v33 = vld [vmem:[%s2811_s17 + $0x60] sm:$0xff] }
 0xcad   :  { %1572 = vmatpush.msra.mxu3 %v1909_v33 }
 0xcae   :  { %1888 = vmatmul.msk.f32.vlgmr.msrb.gmra.mxu3 %vm327_vm9, %v1309_v34  ;;  %v1908_v34 = vld [vmem:[%s2811_s17 + $0x58] sm:$0xff] }
 0xcaf   :  { %1573 = vmatpush.msra.mxu3 %v1908_v34 }
 0xcb1   :  { %1574 = vmatpush.msra.mxu3 %v1907_v35 }
 0xd29   :  { %v1330_v36 = vpop.f32.mrf.mxu2 }
 0xd2a   :  { %1891 = vmatmul.msk.f32.vlgmr.msra.gmra.mxu0 %vm264_vm8, %v1330_v36  ;;  %v1906_v36 = vld [vmem:[%s2811_s17 + $0x48] sm:$0xff] }
 0xd2b   :  { %1575 = vmatpush.msra.mxu3 %v1906_v36 }
 0xd31   :  { %v1353_v37 = vpop.f32.mrf.mxu3 }
 0xd32   :  { %1892 = vmatmul.msk.f32.gmra.mxu0 %vm264_vm8, %v1353_v37  ;;  %v1905_v37 = vld [vmem:[%s2811_s17 + $0x40] sm:$0xff]  ;;  %s1685_s17 = scalar_lea.vmem [#allocation2], %s1684_s26 }
 0xd33   :  { %1576 = vmatpush.msra.mxu3 %v1905_v37 }
 0xda7   :  { %v1382_v39 = vpop.f32.mrf.mxu0 }
 0xda8   :  { %v1412_v40 = vadd.f32 %v1411_v38, %v1382_v39  ;;  %v1955_v38 = vld [vmem:[%s2810_s16 + $0x1] ss:$0 sm:$0xff]  ;;  %s1782_s16 = scalar_lea.vmem [#allocation2], %s1922_s2 }
 0xdaa   :  { %v1417_v42 = vadd.f32 %v1412_v40, %v2550_v53 }
 0xdac   :  { %v1424_v43 = vadd.f32 %v1952_v41, %v1417_v42 }
 0xdae   :  { %v1430_v44 = vsel %vm101_vm0, %v1424_v43, 0.0 }
 0xdaf   :  { %1431 = vadd.xlane.f32.xlu1 %v1430_v44  ;;  %v1385_v46 = vpop.f32.mrf.mxu0 }
 0xdb0   :  { %v1415_v47 = vadd.f32 %v1414_v45, %v1385_v46 }
 0xdb2   :  { %v1418_v48 = vadd.f32 %v1415_v47, %v2559_v61  ;;  %v1901_v61 = vld [vmem:[%s2809_s15 + $0x38] sm:$0xff]  ;;  %s1780_s15 = scalar_lea.vmem [#allocation2], %s1920_s30 }
 0xdb3   :  { %1512 = vmatpush.msra.mxu2 %v1901_v61  ;;  %v1956_v61 = vld [vmem:[%s2812_s18 + $0x1] ss:$0 sm:$0xff] }
 0xdb4   :  { %v1425_v49 = vadd.f32 %v1952_v41, %v1418_v48 }
 0xdb5   :  { %1513 = vmatpush.msra.mxu2 %v1900_v0 }
 0xdb6   :  { %v1433_v50 = vsel %vm101_vm0, %v1425_v49, 0.0 }
 0xdb7   :  { %1434 = vadd.xlane.f32.xlu2 %v1433_v50  ;;  %1514 = vmatpush.msra.mxu2 %v1899_v62 }
 0xdb9   :  { %1515 = vmatpush.msra.mxu2 %v1898_v63 }
 0xe22   :  { %v1432_v51 = vpop.xlane.xlu1 %1431 }
 0xe23   :  { %v1436_v52 = vmul.f32 %v1432_v51, %v2239_v10 }
 0xe25   :  { %v1438_v54 = vsub.f32 %v1424_v43, %v1436_v52 }
 0xe27   :  { %v1440_v55 = vmul.f32 %v1438_v54, %v1438_v54 }
 0xe29   :  { %v1442_v53 = vsel %vm101_vm0, %v1440_v55, 0.0 }
 0xe2a   :  { %v1435_v59 = vpop.xlane.xlu2 %1434  ;;  %1443 = vadd.xlane.f32.xlu0 %v1442_v53 }
 0xe2b   :  { %v1437_v56 = vmul.f32 %v1435_v59, %v2239_v10 }
 0xe2d   :  { %v1439_v57 = vsub.f32 %v1425_v49, %v1437_v56 }
 0xe2f   :  { %v1441_v58 = vmul.f32 %v1439_v57, %v1439_v57 }
 0xe31   :  { %v1445_v60 = vsel %vm101_vm0, %v1441_v58, 0.0 }
 0xe32   :  { %1446 = vadd.xlane.f32.xlu1 %v1445_v60 }
 0xe9d   :  { %v1444_v1 = vpop.xlane.xlu0 %1443 }
 0xe9e   :  { %v1448_v2 = vmul.f32 %v1444_v1, %v2239_v10 }
 0xea0   :  { %v1450_v3 = vadd.f32 1e-12, %v1448_v2 }
 0xea2   :  { %2011 = vrsqrt.f32 %v1450_v3  ;;  %vm1458_vm9 = vweird.f32 %v1450_v3 }
 0xea5   :  { %v1447_v4 = vpop.xlane.xlu1 %1446 }
 0xea6   :  { %v1449_v5 = vmul.f32 %v1447_v4, %v2239_v10 }
 0xea8   :  { %v2012_v6 = vpop.eup %2011  ;;  %v1451_v7 = vadd.f32 1e-12, %v1449_v5 }
 0xea9   :  { %v1453_v8 = vmul.f32 %v2012_v6, %v1450_v3  ;;  %vm1459_vm8 = vweird.f32 %v2012_v6 }
 0xeaa   :  { %2013 = vrsqrt.f32 %v1451_v7  ;;  %vm1460_vm10 = vmor %vm1458_vm9, %vm1459_vm8  ;;  %vm1468_vm12 = vweird.f32 %v1451_v7  ;;  %vm1682_vm8 = vcmask 33792  }
 0xeab   :  { %v1454_v9 = vmul.f32 %v2012_v6, %v1453_v8 }
 0xead   :  { %v1455_v11 = vmul.f32 0.5, %v1454_v9 }
 0xeaf   :  { %v1456_v12 = vsub.f32 1.5, %v1455_v11 }
 0xeb0   :  { %v2014_v13 = vpop.eup %2013 }
 0xeb1   :  { %v1457_v14 = vmul.f32 %v2012_v6, %v1456_v12  ;;  %v1463_v15 = vmul.f32 %v2014_v13, %v1451_v7  ;;  %vm1469_vm11 = vweird.f32 %v2014_v13 }
 0xeb2   :  { %vm1470_vm13 = vmor %vm1468_vm12, %vm1469_vm11 }
 0xeb3   :  { %v1461_v17 = vsel %vm1460_vm10, %v2012_v6, %v1457_v14  ;;  %v1464_v18 = vmul.f32 %v2014_v13, %v1463_v15 }
 0xeb4   :  { %v1472_v19 = vmul.f32 %v1461_v17, %v1438_v54 }
 0xeb5   :  { %v1465_v22 = vmul.f32 0.5, %v1464_v18 }
 0xeb6   :  { %v1477_v23 = vmul.f32 %v1953_v16, %v1472_v19  ;;  %v1654_v19 = vld [vmem:[%s2815_s21 + $0x18] sm:$0xff] }
 0xeb7   :  { %v1466_v24 = vsub.f32 1.5, %v1465_v22  ;;  %1674 = vmatpush.msrb.mxu0 %v1654_v19 }
 0xeb8   :  { %v1482_v25 = vadd.f32 %v1954_v20, %v1477_v23  ;;  %v1652_v23 = vld [vmem:[%s2815_s21 + $0x8] sm:$0xff] }
 0xeb9   :  { %v1467_v21 = vmul.f32 %v2014_v13, %v1466_v24  ;;  %v1651_v24 = vld [vmem:[%s2815_s21] sm:$0xff] }
 0xeba   :  { %1903 = vmatmul.msk.f32.vlgmr.msra.gmra.mxu2 %vm101_vm0, %v1482_v25 }
 0xebb   :  { %v1471_v26 = vsel %vm1470_vm13, %v2014_v13, %v1467_v21  ;;  %v1715_v21 = vld [vmem:[%s2817_s23 + $0x18] sm:$0xff] }
 0xebc   :  { %v1473_v28 = vmul.f32 %v1471_v26, %v1439_v57  ;;  %v1714_v26 = vld [vmem:[%s2817_s23 + $0x10] sm:$0xff]  ;;  %1735 = vmatpush.msrb.mxu1 %v1715_v21 }
 0xebe   :  { %v1478_v27 = vmul.f32 %v1953_v16, %v1473_v28  ;;  %1736 = vmatpush.msrb.mxu1 %v1714_v26 }
 0xec0   :  { %v1483_v29 = vadd.f32 %v1954_v20, %v1478_v27  ;;  %v1653_v20 = vld [vmem:[%s2815_s21 + $0x10] sm:$0xff]  ;;  %v1713_v27 = vld [vmem:[%s2817_s23 + $0x8] sm:$0xff] }
 0xec1   :  { %1675 = vmatpush.msrb.mxu0 %v1653_v20  ;;  %1737 = vmatpush.msrb.mxu1 %v1713_v27 }
 0xec2   :  { %1904 = vmatmul.msk.f32.gmra.mxu2 %vm101_vm0, %v1483_v29 }
 0xec3   :  { %1676 = vmatpush.msrb.mxu0 %v1652_v23  ;;  %1738 = vmatpush.msrb.mxu1 %v1712_v32 }
 0xec5   :  { %1677 = vmatpush.msrb.mxu0 %v1651_v24 }
 0xf3d   :  { %v1517_v39 = vpop.f32.mrf.mxu2 }
 0xf3e   :  { %v1518_v40 = vadd.f32 %v1955_v38, %v1517_v39 }
 0xf40   :  { %v1525_v41 = vmul.f32 0.044715, %v1518_v40  ;;  %v1523_v55 = vmul.f32 0.5, %v1518_v40 }
 0xf42   :  { %v1527_v42 = vmul.f32 %v1525_v41, %v1518_v40 }
 0xf44   :  { %v1529_v43 = vmul.f32 %v1527_v42, %v1518_v40  ;;  %v1958_v42 = vld [vmem:[%s2814_s20 + $0x1] ss:$0 sm:$0xff] }
 0xf45   :  { %v1520_v44 = vpop.f32.mrf.mxu2 }
 0xf46   :  { %v1531_v45 = vadd.f32 %v1529_v43, %v1518_v40  ;;  %v1521_v46 = vadd.f32 %v1955_v38, %v1520_v44  ;;  %v1957_v38 = vld [vmem:[%s2813_s19 + $0x1] ss:$0 sm:$0xff]  ;;  %s1919_s19 = sld [smem:[#allocation3 + $0x1]] }
 0xf48   :  { %v1533_v47 = vmul.f32 0.7978846, %v1531_v45  ;;  %v1526_v48 = vmul.f32 0.044715, %v1521_v46  ;;  %v1524_v57 = vmul.f32 0.5, %v1521_v46 }
 0xf4a   :  { %2015 = vtanh.f32 %v1533_v47  ;;  %v1528_v49 = vmul.f32 %v1526_v48, %v1521_v46 }
 0xf4c   :  { %v1530_v50 = vmul.f32 %v1528_v49, %v1521_v46  ;;  %s1688_s20 = scalar_lea.vmem [#allocation2], %s1919_s19 }
 0xf4e   :  { %v1532_v51 = vadd.f32 %v1530_v50, %v1521_v46 }
 0xf50   :  { %v2016_v52 = vpop.eup %2015  ;;  %v1534_v54 = vmul.f32 0.7978846, %v1532_v51 }
 0xf51   :  { %v1537_v53 = vadd.f32 1.0, %v2016_v52 }
 0xf52   :  { %2017 = vtanh.f32 %v1534_v54 }
 0xf53   :  { %v1539_v59 = vmul.f32 %v1537_v53, %v1523_v55 }
 0xf55   :  { %1914 = vmatmul.msk.f32.vlgmr.msra.gmra.mxu3 %vm813_vm1, %v1539_v59 }
 0xf58   :  { %v2018_v56 = vpop.eup %2017 }
 0xf59   :  { %v1538_v58 = vadd.f32 1.0, %v2018_v56 }
 0xf5b   :  { %v1540_v60 = vmul.f32 %v1538_v58, %v1524_v57 }
 0xf5d   :  { %1915 = vmatmul.msk.f32.gmra.mxu3 %vm813_vm1, %v1540_v60 }
 0xfd8   :  { %v1578_v0 = vpop.f32.mrf.mxu3 }
 0xfd9   :  { %v1579_v62 = vadd.f32 %v1956_v61, %v1578_v0 }
 0xfdb   :  { %v1584_v63 = vadd.f32 %v1579_v62, %v1482_v25 }
 0xfdd   :  { %v1590_v1 = vsel %vm101_vm0, %v1584_v63, 0.0 }
 0xfde   :  { %1591 = vadd.xlane.f32.xlu2 %v1590_v1 }
 0xfe0   :  { %v1581_v2 = vpop.f32.mrf.mxu3 }
 0xfe1   :  { %v1582_v3 = vadd.f32 %v1956_v61, %v1581_v2 }
 0xfe3   :  { %v1585_v4 = vadd.f32 %v1582_v3, %v1483_v29  ;;  %v1960_v3 = vld [vmem:[%s2818_s24] ss:$0 sm:$0xff] }
 0xfe5   :  { %v1593_v5 = vsel %vm101_vm0, %v1585_v4, 0.0 }
 0xfe6   :  { %1594 = vadd.xlane.f32.xlu0 %v1593_v5 }
0x1051   :  { %v1592_v6 = vpop.xlane.xlu2 %1591 }
0x1052   :  { %v1596_v7 = vmul.f32 %v1592_v6, %v2239_v10 }
0x1054   :  { %v1598_v8 = vsub.f32 %v1584_v63, %v1596_v7  ;;  %v1959_v63 = vld [vmem:[%s2816_s22] ss:$0 sm:$0xff] }
0x1056   :  { %v1600_v9 = vmul.f32 %v1598_v8, %v1598_v8 }
0x1058   :  { %v1602_v11 = vsel %vm101_vm0, %v1600_v9, 0.0 }
0x1059   :  { %1603 = vadd.xlane.f32.xlu1 %v1602_v11  ;;  %v1595_v12 = vpop.xlane.xlu0 %1594 }
0x105a   :  { %v1597_v13 = vmul.f32 %v1595_v12, %v2239_v10 }
0x105c   :  { %v1599_v14 = vsub.f32 %v1585_v4, %v1597_v13 }
0x105e   :  { %v1601_v15 = vmul.f32 %v1599_v14, %v1599_v14 }
0x1060   :  { %v1605_v16 = vsel %vm101_vm0, %v1601_v15, 0.0 }
0x1061   :  { %1606 = vadd.xlane.f32.xlu2 %v1605_v16 }
0x10cc   :  { %v1604_v17 = vpop.xlane.xlu1 %1603 }
0x10cd   :  { %v1608_v18 = vmul.f32 %v1604_v17, %v2239_v10 }
0x10cf   :  { %v1610_v22 = vadd.f32 1e-12, %v1608_v18 }
0x10d1   :  { %2019 = vrsqrt.f32 %v1610_v22  ;;  %vm1618_vm15 = vweird.f32 %v1610_v22 }
0x10d4   :  { %v1607_v25 = vpop.xlane.xlu2 %1606 }
0x10d5   :  { %v1609_v28 = vmul.f32 %v1607_v25, %v2239_v10 }
0x10d7   :  { %v2020_v29 = vpop.eup %2019  ;;  %v1611_v30 = vadd.f32 1e-12, %v1609_v28 }
0x10d8   :  { %v1613_v31 = vmul.f32 %v2020_v29, %v1610_v22  ;;  %vm1619_vm14 = vweird.f32 %v2020_v29 }
0x10d9   :  { %2021 = vrsqrt.f32 %v1611_v30  ;;  %vm1620_vm1 = vmor %vm1618_vm15, %vm1619_vm14  ;;  %vm1628_vm3 = vweird.f32 %v1611_v30 }
0x10da   :  { %v1614_v33 = vmul.f32 %v2020_v29, %v1613_v31 }
0x10dc   :  { %v1615_v34 = vmul.f32 0.5, %v1614_v33 }
0x10de   :  { %v1616_v35 = vsub.f32 1.5, %v1615_v34 }
0x10df   :  { %v2022_v10 = vpop.eup %2021 }
0x10e0   :  { %v1617_v36 = vmul.f32 %v2020_v29, %v1616_v35  ;;  %v1623_v37 = vmul.f32 %v2022_v10, %v1611_v30  ;;  %vm1629_vm2 = vweird.f32 %v2022_v10 }
0x10e1   :  { %vm1630_vm4 = vmor %vm1628_vm3, %vm1629_vm2 }
0x10e2   :  { %v1621_v39 = vsel %vm1620_vm1, %v2020_v29, %v1617_v36  ;;  %v1624_v40 = vmul.f32 %v2022_v10, %v1623_v37 }
0x10e3   :  { %v1632_v41 = vmul.f32 %v1621_v39, %v1598_v8 }
0x10e4   :  { %v1625_v43 = vmul.f32 0.5, %v1624_v40 }
0x10e5   :  { %v1637_v44 = vmul.f32 %v1957_v38, %v1632_v41 }
0x10e6   :  { %v1626_v45 = vsub.f32 1.5, %v1625_v43 }
0x10e7   :  { %v1642_v46 = vadd.f32 %v1958_v42, %v1637_v44 }
0x10e8   :  { %v1627_v47 = vmul.f32 %v2022_v10, %v1626_v45 }
0x10e9   :  { %1644 = vst.msk [vmem:[#allocation2] sm:$0xff] %vm101_vm0, %v1642_v46 }
0x10ea   :  { %v1631_v48 = vsel %vm1630_vm4, %v2022_v10, %v1627_v47 }
0x10eb   :  { %v1633_v49 = vmul.f32 %v1631_v48, %v1599_v14 }
0x10ed   :  { %v1638_v50 = vmul.f32 %v1957_v38, %v1633_v49 }
0x10ef   :  { %v1643_v51 = vadd.f32 %v1958_v42, %v1638_v50 }
0x10f1   :  { %1645 = vst.msk [vmem:[#allocation2 + $0x8] sm:$0xff] %vm101_vm0, %v1643_v51  ;;  %v1647_v52 = vrot.slane %v1643_v51, 7 }
0x10f3   :  { %v1650_v54 = vsel %vm1649_vm5, %v1642_v46, %v1647_v52 }
0x10f4   :  { %1918 = vmatmul.msk.f32.vlgmr.msrb.gmra.mxu0 %vm101_vm0, %v1650_v54 }
0x10f8   :  { %v1689_v55 = vld [vmem:[%s1688_s20] sm:$0x1]  ;;  %v1921_v53 = vld [vmem:[%s1780_s15 + $0x8] sm:$0x1] }
0x10f9   :  { %v1923_v59 = vld [vmem:[%s1782_s16 + $0x8] sm:$0x1]  ;;  %v1699_v56 = vrot.slane %v1689_v55, 7  ;;  %v1702_v57 = vrot.slane %v1921_v53, 6  ;;  %v1686_v58 = vld [vmem:[%s1685_s17] sm:$0x1] }
0x10fa   :  { %v1705_v60 = vrot.slane %v1923_v59, 5 }
0x10fb   :  { %v1707_v61 = vsel %vm1649_vm5, %v1686_v58, %v1699_v56 }
0x10fc   :  { %v1709_v0 = vsel %vm1708_vm6, %v1707_v61, %v1702_v57 }
0x10fd   :  { %v1711_v62 = vsel %vm1710_vm7, %v1709_v0, %v1705_v60 }
0x10fe   :  { %1924 = vmatmul.msk.f32.vlgmr.msrb.gmra.mxu1 %vm101_vm0, %v1711_v62  ;;  %vm1743_vm0 = vcmask 257024  }
0x1171   :  { %v1679_v1 = vpop.f32.mrf.mxu0 }
0x1172   :  { %v1680_v2 = vadd.f32 %v1959_v63, %v1679_v1 }
0x1174   :  { %1683 = vst.msk [vmem:[#allocation6] sm:$0x3] %vm1682_vm8, %v1680_v2 }
0x1175   :  { %1755 = dma.vmem_to_hbm [thread:$0]  %s1751_s4, 32, %s1753_s14, [#allocation4]  }
0x117b   :  { %v1740_v4 = vpop.f32.mrf.mxu1 }
0x117c   :  { %v1741_v5 = vadd.f32 %v1960_v3, %v1740_v4 }
0x117e   :  { %1744 = vst.msk [vmem:[#allocation7] sm:$0xf] %vm1743_vm0, %v1741_v5 }
0x117f   :  { %1766 = dma.vmem_to_hbm [thread:$0]  %s1762_s8, 64, %s1764_s11, [#allocation8]  }
0x1180   :  { %2085 = dma.done.wait [#allocation4], 32  }
0x1181   :  { %2086 = vsyncadd [#allocation4], 4294967264 }
0x1182   :  { %2087 = dma.done.wait [#allocation8], 64  }
0x1183   :  { %2088 = vsyncadd [#allocation8], 4294967232 }
0x1184   :  { %1775 = vsyncpa [#allocation4], 1 }
0x1185   :  { %1776 = vsyncpa [#allocation8], 1 }
0x1186   :  { %1777 = vsyncpa [#allocation5], 1 }

</bundles_post_ra>
